<compile_context>
chip_gen: v7x
topology: tpu7x:2x2x1
jax: 0.10.0
libtpu: 0.0.40
codegen_flags: <defaults>
</compile_context>

<pallas_src>
import numpy as np

import jax
import jax.numpy as jnp
from jax.experimental import pallas as pl
from jax.experimental.pallas import tpu as pltpu


# ----------------------------------------------------------------------------
# One-time (init) weight packing -- host-side numpy, NOT on the hot path.
# ----------------------------------------------------------------------------
def _pack_conv(w_b0, w_b1, b_b0, b_b1, w_in, pool):
    """Pack both branches' conv weights into per-ky matrices.

    Input activation column layout : col = br*(w_in*Cin) + x*Cin + ci
    Output (pre-pool) column layout:
       pool=True : col = q*(2*OWp*Cout) + br*(OWp*Cout) + oxp*Cout + co,
                   where ox = 2*oxp + q     (even/odd ox in contiguous halves)
       pool=False: col = br*(OW*Cout) + ox*Cout + co
    """
    w = np.stack([np.asarray(w_b0, np.float32), np.asarray(w_b1, np.float32)])
    b = np.stack([np.asarray(b_b0, np.float32), np.asarray(b_b1, np.float32)])
    _, cout, cin, kh, kw = w.shape
    ow = w_in - kw + 1
    ncol_in = 2 * w_in * cin
    owp = ow // 2
    ncol_out = 2 * 2 * owp * cout if pool else 2 * ow * cout

    wk = np.zeros((kh, ncol_in, ncol_out), np.float32)
    ci = np.arange(cin)
    co = np.arange(cout)
    for ky in range(kh):
        for br in range(2):
            for ox in range(ow):
                for kx in range(kw):
                    x_in = ox + kx
                    col_in = br * w_in * cin + x_in * cin + ci
                    if pool:
                        q, oxp = ox % 2, ox // 2
                        col_out = (q * (2 * owp * cout) + br * (owp * cout)
                                   + oxp * cout + co)
                    else:
                        col_out = br * (ow * cout) + ox * cout + co
                    wk[ky][np.ix_(col_in, col_out)] = w[br, :, :, ky, kx].T

    if pool:
        brow = np.broadcast_to(b[None, :, None, :],
                               (2, 2, owp, cout)).reshape(1, -1)
    else:
        brow = np.broadcast_to(b[:, None, :], (2, ow, cout)).reshape(1, -1)
    return (jnp.asarray(wk, jnp.bfloat16),
            jnp.asarray(np.array(brow, np.float32)))


def _block_diag(a, b):
    out = np.zeros((a.shape[0] + b.shape[0], a.shape[1] + b.shape[1]),
                   np.float32)
    out[:a.shape[0], :a.shape[1]] = a
    out[a.shape[0]:, a.shape[1]:] = b
    return out


def pack_params(p1, p2, ph):
    """Fold / transpose / block-diagonally merge all weights once, at init."""
    f32, bf16 = jnp.float32, jnp.bfloat16
    packed = {}

    packed["w1"], packed["b1"] = _pack_conv(p1["conv1_w"], p2["conv1_w"],
                                            p1["conv1_b"], p2["conv1_b"],
                                            w_in=14, pool=True)
    packed["w2"], packed["b2"] = _pack_conv(p1["conv2_w"], p2["conv2_w"],
                                            p1["conv2_b"], p2["conv2_b"],
                                            w_in=6, pool=True)
    packed["w3"], packed["b3"] = _pack_conv(p1["conv3_w"], p2["conv3_w"],
                                            p1["conv3_b"], p2["conv3_b"],
                                            w_in=2, pool=False)

    # fc1 (both branches, block-diagonal)
    f1a = np.asarray(p1["fc1_w"], np.float32).T          # (120, 84)
    f1b = np.asarray(p2["fc1_w"], np.float32).T
    packed["wf1"] = jnp.asarray(_block_diag(f1a, f1b), bf16)
    packed["bf1"] = jnp.asarray(np.concatenate(
        [np.asarray(p1["fc1_b"], np.float32),
         np.asarray(p2["fc1_b"], np.float32)])[None, :], f32)

    # BatchNorm1d (eval) folded into fc2:  (h*scale+shift)@W.T+b
    def folded_fc2(p):
        scale = (np.asarray(p["bn_gamma"], np.float32)
                 / np.sqrt(np.asarray(p["bn_var"], np.float32) + 1e-5))
        shift = (np.asarray(p["bn_beta"], np.float32)
                 - np.asarray(p["bn_mean"], np.float32) * scale)
        w2t = np.asarray(p["fc2_w"], np.float32).T       # (84, 10)
        return scale[:, None] * w2t, shift @ w2t + np.asarray(p["fc2_b"],
                                                              np.float32)

    w2a, b2a = folded_fc2(p1)
    w2b, b2b = folded_fc2(p2)
    packed["wf2"] = jnp.asarray(_block_diag(w2a, w2b), bf16)
    packed["bf2"] = jnp.asarray(np.concatenate([b2a, b2b])[None, :], f32)

    # final fullyConnected head (Dropout == identity in eval mode)
    packed["wh1"] = jnp.asarray(np.asarray(ph["w1"], np.float32).T, bf16)
    packed["bh1"] = jnp.asarray(np.asarray(ph["b1"], np.float32)[None, :], f32)
    packed["wh2"] = jnp.asarray(np.asarray(ph["w2"], np.float32).T, bf16)
    packed["bh2"] = jnp.asarray(np.asarray(ph["b2"], np.float32)[None, :], f32)
    packed["wh3"] = jnp.asarray(np.asarray(ph["w3"], np.float32).T, bf16)
    packed["bh3"] = jnp.asarray(np.asarray(ph["b3"], np.float32)[None, :], f32)
    return packed


def _make_row_select(n, h, kh, pool):
    """0/1 matrices R[ky]: pick input rows (n*h + oy + ky) and order output
    rows as (parity, n, oy') so vertical 2x2 pooling is max of two halves."""
    oh = h - kh + 1
    r = np.zeros((kh, n * oh, n * h), np.float32)
    for ky in range(kh):
        if pool:
            ohp = oh // 2
            for p in range(2):
                for nn in range(n):
                    for oyp in range(ohp):
                        row = p * n * ohp + nn * ohp + oyp
                        r[ky, row, nn * h + 2 * oyp + p + ky] = 1.0
        else:
            for nn in range(n):
                for oy in range(oh):
                    r[ky, nn * oh + oy, nn * h + oy + ky] = 1.0
    return jnp.asarray(r, jnp.bfloat16)


# ----------------------------------------------------------------------------
# The single fused kernel
# ----------------------------------------------------------------------------
def _fused_forward_kernel(
        a0_ref, r1_ref, w1_ref, b1_ref, r2_ref, w2_ref, b2_ref,
        r3_ref, w3_ref, b3_ref, wf1_ref, bf1_ref, wf2_ref, bf2_ref,
        wh1_ref, bh1_ref, wh2_ref, bh2_ref, wh3_ref, bh3_ref,
        x1_ref, x2_ref, res_ref):
    bf16 = jnp.bfloat16

    def mm(a, b):  # bf16 MXU matmul, f32 accumulation
        return jnp.dot(a.astype(bf16), b.astype(bf16),
                       preferred_element_type=jnp.float32)

    def conv_block(a, r_ref, w_ref, b_ref, pool):
        kh = r_ref.shape[0]
        z = mm(mm(r_ref[0], a), w_ref[0])
        for ky in range(1, kh):
            z = z + mm(mm(r_ref[ky], a), w_ref[ky])
        z = jnp.maximum(z + b_ref[...], 0.0)              # bias + ReLU (f32)
        if pool:  # 2x2 max-pool: even/odd rows, then even/odd column halves
            hr = z.shape[0] // 2
            z = jnp.maximum(z[:hr, :], z[hr:, :])
            hc = z.shape[1] // 2
            z = jnp.maximum(z[:, :hc], z[:, hc:])
        return z

    a0 = a0_ref[...]                                       # (N*14, 2*14)
    a1 = conv_block(a0, r1_ref, w1_ref, b1_ref, True)      # (N*6,  2*6*16)
    a2 = conv_block(a1, r2_ref, w2_ref, b2_ref, True)      # (N*2,  2*2*32)
    a3 = conv_block(a2, r3_ref, w3_ref, b3_ref, False)     # (N,    2*120)

    # Branch FC heads (block-diagonal over the two branches), BN folded in fc2
    h = jnp.maximum(mm(a3, wf1_ref[...]) + bf1_ref[...], 0.0)   # (N, 168)
    logits = mm(h, wf2_ref[...]) + bf2_ref[...]                 # (N, 20)

    def softmax(l):
        m = jnp.max(l, axis=-1, keepdims=True)
        e = jnp.exp(l - m)
        return e / jnp.sum(e, axis=-1, keepdims=True)

    nb = logits.shape[1] // 2
    x1 = softmax(logits[:, :nb])
    x2 = softmax(logits[:, nb:])
    x1_ref[...] = x1
    x2_ref[...] = x2

    # Final fullyConnected head (Dropout == identity in eval mode)
    xcat = jnp.concatenate([x1, x2], axis=1)                    # (N, 20)
    g = jnp.maximum(mm(xcat, wh1_ref[...]) + bh1_ref[...], 0.0)  # (N, 200)
    g = jnp.maximum(mm(g, wh2_ref[...]) + bh2_ref[...], 0.0)     # (N, 84)
    z = mm(g, wh3_ref[...]) + bh3_ref[...]                       # (N, 1)
    res_ref[...] = 1.0 / (1.0 + jnp.exp(-z))


# ----------------------------------------------------------------------------
# Forward wrapper: one reshape+concat at the boundary, then ONE pallas_call.
# ----------------------------------------------------------------------------
def aloss_lenet5_forward(x, packed):
    """x: (N, 2, 14, 14) float32.  Returns (x1, x2, res)."""
    n, _, h, w = x.shape
    # boundary glue: rows=(n, y), cols=(branch, x)
    a0 = jnp.concatenate([x[:, 0].reshape(n * h, w),
                          x[:, 1].reshape(n * h, w)], axis=1)

    r1 = _make_row_select(n, 14, 3, pool=True)
    r2 = _make_row_select(n, 6, 3, pool=True)
    r3 = _make_row_select(n, 2, 2, pool=False)

    args = (a0, r1, packed["w1"], packed["b1"],
            r2, packed["w2"], packed["b2"],
            r3, packed["w3"], packed["b3"],
            packed["wf1"], packed["bf1"], packed["wf2"], packed["bf2"],
            packed["wh1"], packed["bh1"], packed["wh2"], packed["bh2"],
            packed["wh3"], packed["bh3"])

    out_shape = (jax.ShapeDtypeStruct((n, 10), jnp.float32),
                 jax.ShapeDtypeStruct((n, 10), jnp.float32),
                 jax.ShapeDtypeStruct((n, 1), jnp.float32))

    x1, x2, res = pl.pallas_call(
        _fused_forward_kernel,
        out_shape=out_shape,
        in_specs=[pl.BlockSpec(memory_space=pltpu.MemorySpace.VMEM)
                  for _ in range(len(args))],
        out_specs=tuple(pl.BlockSpec(memory_space=pltpu.MemorySpace.VMEM)
                        for _ in range(3)),
    )(*args)
    return x1, x2, res


# ----------------------------------------------------------------------------
# Deterministic parameter init (PyTorch shapes: Linear weight is (out, in))
# ----------------------------------------------------------------------------
def _rand(k, shape, scale=0.1):
    return scale * jax.random.normal(k, shape, dtype=jnp.float32)


def init_branch_params(key):
    ks = jax.random.split(key, 10)
    return dict(
        conv1_w=_rand(ks[0], (16, 1, 3, 3)),   conv1_b=_rand(ks[1], (16,)),
        conv2_w=_rand(ks[2], (32, 16, 3, 3)),  conv2_b=_rand(ks[3], (32,)),
        conv3_w=_rand(ks[4], (120, 32, 2, 2)), conv3_b=_rand(ks[5], (120,)),
        fc1_w=_rand(ks[6], (84, 120)),         fc1_b=_rand(ks[7], (84,)),
        fc2_w=_rand(ks[8], (10, 84)),          fc2_b=_rand(ks[9], (10,)),
        bn_gamma=jnp.ones((84,), jnp.float32),
        bn_beta=jnp.zeros((84,), jnp.float32),
        bn_mean=jnp.zeros((84,), jnp.float32),
        bn_var=jnp.ones((84,), jnp.float32),
    )


def init_head_params(key):
    ks = jax.random.split(key, 6)
    return dict(
        w1=_rand(ks[0], (200, 20)),  b1=_rand(ks[1], (200,)),
        w2=_rand(ks[2], (84, 200)),  b2=_rand(ks[3], (84,)),
        w3=_rand(ks[4], (1, 84)),    b3=_rand(ks[5], (1,)),
    )


if __name__ == "__main__":
    key = jax.random.PRNGKey(0)
    kx, k1, k2, khead = jax.random.split(key, 4)
    # LeNet-5 pair-classification input: batch=2, 2 channels, 14x14 images
    x = jax.random.normal(kx, (2, 2, 14, 14), dtype=jnp.float32)
    p1 = init_branch_params(k1)
    p2 = init_branch_params(k2)
    ph = init_head_params(khead)

    packed = pack_params(p1, p2, ph)        # one-time weight packing (init)

    fwd = jax.jit(aloss_lenet5_forward)
    x1, x2, res = fwd(x, packed)
    jax.block_until_ready((x1, x2, res))

    assert x1.shape == (2, 10) and x2.shape == (2, 10) and res.shape == (2, 1)
    # softmax rows sum to 1, sigmoid output in (0, 1)
    assert jnp.allclose(jnp.sum(x1, axis=1), 1.0, atol=1e-5)
    assert jnp.allclose(jnp.sum(x2, axis=1), 1.0, atol=1e-5)
    assert bool(jnp.all((res > 0.0) & (res < 1.0)))
    print("KERNEL_OK")
</pallas_src>

<mosaic_0001>
module attributes {stable_mosaic.version = 11 : i64} {
  func.func @_fused_forward_kernel(%arg0: memref<28x28xf32, #tpu.memory_space<vmem>>, %arg1: memref<3x24x28xbf16, #tpu.memory_space<vmem>>, %arg2: memref<3x28x384xbf16, #tpu.memory_space<vmem>>, %arg3: memref<1x384xf32, #tpu.memory_space<vmem>>, %arg4: memref<3x8x12xbf16, #tpu.memory_space<vmem>>, %arg5: memref<3x192x256xbf16, #tpu.memory_space<vmem>>, %arg6: memref<1x256xf32, #tpu.memory_space<vmem>>, %arg7: memref<2x2x4xbf16, #tpu.memory_space<vmem>>, %arg8: memref<2x128x240xbf16, #tpu.memory_space<vmem>>, %arg9: memref<1x240xf32, #tpu.memory_space<vmem>>, %arg10: memref<240x168xbf16, #tpu.memory_space<vmem>>, %arg11: memref<1x168xf32, #tpu.memory_space<vmem>>, %arg12: memref<168x20xbf16, #tpu.memory_space<vmem>>, %arg13: memref<1x20xf32, #tpu.memory_space<vmem>>, %arg14: memref<20x200xbf16, #tpu.memory_space<vmem>>, %arg15: memref<1x200xf32, #tpu.memory_space<vmem>>, %arg16: memref<200x84xbf16, #tpu.memory_space<vmem>>, %arg17: memref<1x84xf32, #tpu.memory_space<vmem>>, %arg18: memref<84x1xbf16, #tpu.memory_space<vmem>>, %arg19: memref<1x1xf32, #tpu.memory_space<vmem>>, %arg20: memref<2x10xf32, #tpu.memory_space<vmem>>, %arg21: memref<2x10xf32, #tpu.memory_space<vmem>>, %arg22: memref<2x1xf32, #tpu.memory_space<vmem>>) attributes {dimension_semantics = [], scalar_prefetch = 0 : i64, scratch_operands = 0 : i64, tpu.core_type = #tpu.core_type<tc>} {
    %c0 = arith.constant 0 : index
    %c0_0 = arith.constant 0 : index
    %0 = vector.load %arg0[%c0, %c0_0] : memref<28x28xf32, #tpu.memory_space<vmem>>, vector<28x28xf32>
    %c0_1 = arith.constant 0 : index
    %c0_2 = arith.constant 0 : index
    %c0_3 = arith.constant 0 : index
    %1 = vector.load %arg1[%c0_1, %c0_2, %c0_3] : memref<3x24x28xbf16, #tpu.memory_space<vmem>>, vector<1x24x28xbf16>
    %2 = vector.shape_cast %1 : vector<1x24x28xbf16> to vector<24x28xbf16>
    %3 = arith.truncf %0 : vector<28x28xf32> to vector<28x28xbf16>
    %cst = arith.constant dense<0.000000e+00> : vector<24x28xf32>
    %4 = tpu.matmul %2, %3, %cst {dimension_numbers = #tpu.dot_dimension_numbers<[1], [0], [0], [1], [0, 0, 1, 1], [], []>} : vector<24x28xbf16>, vector<28x28xbf16>, vector<24x28xf32> -> vector<24x28xf32>
    %c0_4 = arith.constant 0 : index
    %c0_5 = arith.constant 0 : index
    %c0_6 = arith.constant 0 : index
    %5 = vector.load %arg2[%c0_4, %c0_5, %c0_6] : memref<3x28x384xbf16, #tpu.memory_space<vmem>>, vector<1x28x384xbf16>
    %6 = vector.shape_cast %5 : vector<1x28x384xbf16> to vector<28x384xbf16>
    %7 = arith.truncf %4 : vector<24x28xf32> to vector<24x28xbf16>
    %cst_7 = arith.constant dense<0.000000e+00> : vector<24x384xf32>
    %8 = tpu.matmul %7, %6, %cst_7 {dimension_numbers = #tpu.dot_dimension_numbers<[1], [0], [0], [1], [0, 0, 1, 1], [], []>} : vector<24x28xbf16>, vector<28x384xbf16>, vector<24x384xf32> -> vector<24x384xf32>
    %c1 = arith.constant 1 : index
    %c0_8 = arith.constant 0 : index
    %c0_9 = arith.constant 0 : index
    %9 = vector.load %arg1[%c1, %c0_8, %c0_9] : memref<3x24x28xbf16, #tpu.memory_space<vmem>>, vector<1x24x28xbf16>
    %10 = vector.shape_cast %9 : vector<1x24x28xbf16> to vector<24x28xbf16>
    %11 = arith.truncf %0 : vector<28x28xf32> to vector<28x28xbf16>
    %cst_10 = arith.constant dense<0.000000e+00> : vector<24x28xf32>
    %12 = tpu.matmul %10, %11, %cst_10 {dimension_numbers = #tpu.dot_dimension_numbers<[1], [0], [0], [1], [0, 0, 1, 1], [], []>} : vector<24x28xbf16>, vector<28x28xbf16>, vector<24x28xf32> -> vector<24x28xf32>
    %c1_11 = arith.constant 1 : index
    %c0_12 = arith.constant 0 : index
    %c0_13 = arith.constant 0 : index
    %13 = vector.load %arg2[%c1_11, %c0_12, %c0_13] : memref<3x28x384xbf16, #tpu.memory_space<vmem>>, vector<1x28x384xbf16>
    %14 = vector.shape_cast %13 : vector<1x28x384xbf16> to vector<28x384xbf16>
    %15 = arith.truncf %12 : vector<24x28xf32> to vector<24x28xbf16>
    %cst_14 = arith.constant dense<0.000000e+00> : vector<24x384xf32>
    %16 = tpu.matmul %15, %14, %cst_14 {dimension_numbers = #tpu.dot_dimension_numbers<[1], [0], [0], [1], [0, 0, 1, 1], [], []>} : vector<24x28xbf16>, vector<28x384xbf16>, vector<24x384xf32> -> vector<24x384xf32>
    %17 = arith.addf %8, %16 : vector<24x384xf32>
    %c2 = arith.constant 2 : index
    %c0_15 = arith.constant 0 : index
    %c0_16 = arith.constant 0 : index
    %18 = vector.load %arg1[%c2, %c0_15, %c0_16] : memref<3x24x28xbf16, #tpu.memory_space<vmem>>, vector<1x24x28xbf16>
    %19 = vector.shape_cast %18 : vector<1x24x28xbf16> to vector<24x28xbf16>
    %20 = arith.truncf %0 : vector<28x28xf32> to vector<28x28xbf16>
    %cst_17 = arith.constant dense<0.000000e+00> : vector<24x28xf32>
    %21 = tpu.matmul %19, %20, %cst_17 {dimension_numbers = #tpu.dot_dimension_numbers<[1], [0], [0], [1], [0, 0, 1, 1], [], []>} : vector<24x28xbf16>, vector<28x28xbf16>, vector<24x28xf32> -> vector<24x28xf32>
    %c2_18 = arith.constant 2 : index
    %c0_19 = arith.constant 0 : index
    %c0_20 = arith.constant 0 : index
    %22 = vector.load %arg2[%c2_18, %c0_19, %c0_20] : memref<3x28x384xbf16, #tpu.memory_space<vmem>>, vector<1x28x384xbf16>
    %23 = vector.shape_cast %22 : vector<1x28x384xbf16> to vector<28x384xbf16>
    %24 = arith.truncf %21 : vector<24x28xf32> to vector<24x28xbf16>
    %cst_21 = arith.constant dense<0.000000e+00> : vector<24x384xf32>
    %25 = tpu.matmul %24, %23, %cst_21 {dimension_numbers = #tpu.dot_dimension_numbers<[1], [0], [0], [1], [0, 0, 1, 1], [], []>} : vector<24x28xbf16>, vector<28x384xbf16>, vector<24x384xf32> -> vector<24x384xf32>
    %26 = arith.addf %17, %25 : vector<24x384xf32>
    %c0_22 = arith.constant 0 : index
    %c0_23 = arith.constant 0 : index
    %27 = vector.load %arg3[%c0_22, %c0_23] : memref<1x384xf32, #tpu.memory_space<vmem>>, vector<1x384xf32>
    %28 = vector.broadcast %27 : vector<1x384xf32> to vector<24x384xf32>
    %29 = arith.addf %26, %28 : vector<24x384xf32>
    %cst_24 = arith.constant 0.000000e+00 : f32
    %30 = vector.broadcast %cst_24 : f32 to vector<24x384xf32>
    %31 = arith.maximumf %29, %30 : vector<24x384xf32>
    %32 = vector.extract_strided_slice %31 {offsets = [0, 0], sizes = [12, 384], strides = [1, 1]} : vector<24x384xf32> to vector<12x384xf32>
    %33 = vector.extract_strided_slice %31 {offsets = [12, 0], sizes = [12, 384], strides = [1, 1]} : vector<24x384xf32> to vector<12x384xf32>
    %34 = arith.maximumf %32, %33 : vector<12x384xf32>
    %35 = vector.extract_strided_slice %34 {offsets = [0, 0], sizes = [12, 192], strides = [1, 1]} : vector<12x384xf32> to vector<12x192xf32>
    %36 = vector.extract_strided_slice %34 {offsets = [0, 192], sizes = [12, 192], strides = [1, 1]} : vector<12x384xf32> to vector<12x192xf32>
    %37 = arith.maximumf %35, %36 : vector<12x192xf32>
    %c0_25 = arith.constant 0 : index
    %c0_26 = arith.constant 0 : index
    %c0_27 = arith.constant 0 : index
    %38 = vector.load %arg4[%c0_25, %c0_26, %c0_27] : memref<3x8x12xbf16, #tpu.memory_space<vmem>>, vector<1x8x12xbf16>
    %39 = vector.shape_cast %38 : vector<1x8x12xbf16> to vector<8x12xbf16>
    %40 = arith.truncf %37 : vector<12x192xf32> to vector<12x192xbf16>
    %cst_28 = arith.constant dense<0.000000e+00> : vector<8x192xf32>
    %41 = tpu.matmul %39, %40, %cst_28 {dimension_numbers = #tpu.dot_dimension_numbers<[1], [0], [0], [1], [0, 0, 1, 1], [], []>} : vector<8x12xbf16>, vector<12x192xbf16>, vector<8x192xf32> -> vector<8x192xf32>
    %c0_29 = arith.constant 0 : index
    %c0_30 = arith.constant 0 : index
    %c0_31 = arith.constant 0 : index
    %42 = vector.load %arg5[%c0_29, %c0_30, %c0_31] : memref<3x192x256xbf16, #tpu.memory_space<vmem>>, vector<1x192x256xbf16>
    %43 = vector.shape_cast %42 : vector<1x192x256xbf16> to vector<192x256xbf16>
    %44 = arith.truncf %41 : vector<8x192xf32> to vector<8x192xbf16>
    %cst_32 = arith.constant dense<0.000000e+00> : vector<8x256xf32>
    %45 = tpu.matmul %44, %43, %cst_32 {dimension_numbers = #tpu.dot_dimension_numbers<[1], [0], [0], [1], [0, 0, 1, 1], [], []>} : vector<8x192xbf16>, vector<192x256xbf16>, vector<8x256xf32> -> vector<8x256xf32>
    %c1_33 = arith.constant 1 : index
    %c0_34 = arith.constant 0 : index
    %c0_35 = arith.constant 0 : index
    %46 = vector.load %arg4[%c1_33, %c0_34, %c0_35] : memref<3x8x12xbf16, #tpu.memory_space<vmem>>, vector<1x8x12xbf16>
    %47 = vector.shape_cast %46 : vector<1x8x12xbf16> to vector<8x12xbf16>
    %48 = arith.truncf %37 : vector<12x192xf32> to vector<12x192xbf16>
    %cst_36 = arith.constant dense<0.000000e+00> : vector<8x192xf32>
    %49 = tpu.matmul %47, %48, %cst_36 {dimension_numbers = #tpu.dot_dimension_numbers<[1], [0], [0], [1], [0, 0, 1, 1], [], []>} : vector<8x12xbf16>, vector<12x192xbf16>, vector<8x192xf32> -> vector<8x192xf32>
    %c1_37 = arith.constant 1 : index
    %c0_38 = arith.constant 0 : index
    %c0_39 = arith.constant 0 : index
    %50 = vector.load %arg5[%c1_37, %c0_38, %c0_39] : memref<3x192x256xbf16, #tpu.memory_space<vmem>>, vector<1x192x256xbf16>
    %51 = vector.shape_cast %50 : vector<1x192x256xbf16> to vector<192x256xbf16>
    %52 = arith.truncf %49 : vector<8x192xf32> to vector<8x192xbf16>
    %cst_40 = arith.constant dense<0.000000e+00> : vector<8x256xf32>
    %53 = tpu.matmul %52, %51, %cst_40 {dimension_numbers = #tpu.dot_dimension_numbers<[1], [0], [0], [1], [0, 0, 1, 1], [], []>} : vector<8x192xbf16>, vector<192x256xbf16>, vector<8x256xf32> -> vector<8x256xf32>
    %54 = arith.addf %45, %53 : vector<8x256xf32>
    %c2_41 = arith.constant 2 : index
    %c0_42 = arith.constant 0 : index
    %c0_43 = arith.constant 0 : index
    %55 = vector.load %arg4[%c2_41, %c0_42, %c0_43] : memref<3x8x12xbf16, #tpu.memory_space<vmem>>, vector<1x8x12xbf16>
    %56 = vector.shape_cast %55 : vector<1x8x12xbf16> to vector<8x12xbf16>
    %57 = arith.truncf %37 : vector<12x192xf32> to vector<12x192xbf16>
    %cst_44 = arith.constant dense<0.000000e+00> : vector<8x192xf32>
    %58 = tpu.matmul %56, %57, %cst_44 {dimension_numbers = #tpu.dot_dimension_numbers<[1], [0], [0], [1], [0, 0, 1, 1], [], []>} : vector<8x12xbf16>, vector<12x192xbf16>, vector<8x192xf32> -> vector<8x192xf32>
    %c2_45 = arith.constant 2 : index
    %c0_46 = arith.constant 0 : index
    %c0_47 = arith.constant 0 : index
    %59 = vector.load %arg5[%c2_45, %c0_46, %c0_47] : memref<3x192x256xbf16, #tpu.memory_space<vmem>>, vector<1x192x256xbf16>
    %60 = vector.shape_cast %59 : vector<1x192x256xbf16> to vector<192x256xbf16>
    %61 = arith.truncf %58 : vector<8x192xf32> to vector<8x192xbf16>
    %cst_48 = arith.constant dense<0.000000e+00> : vector<8x256xf32>
    %62 = tpu.matmul %61, %60, %cst_48 {dimension_numbers = #tpu.dot_dimension_numbers<[1], [0], [0], [1], [0, 0, 1, 1], [], []>} : vector<8x192xbf16>, vector<192x256xbf16>, vector<8x256xf32> -> vector<8x256xf32>
    %63 = arith.addf %54, %62 : vector<8x256xf32>
    %c0_49 = arith.constant 0 : index
    %c0_50 = arith.constant 0 : index
    %64 = vector.load %arg6[%c0_49, %c0_50] : memref<1x256xf32, #tpu.memory_space<vmem>>, vector<1x256xf32>
    %65 = vector.broadcast %64 : vector<1x256xf32> to vector<8x256xf32>
    %66 = arith.addf %63, %65 : vector<8x256xf32>
    %cst_51 = arith.constant 0.000000e+00 : f32
    %67 = vector.broadcast %cst_51 : f32 to vector<8x256xf32>
    %68 = arith.maximumf %66, %67 : vector<8x256xf32>
    %69 = vector.extract_strided_slice %68 {offsets = [0, 0], sizes = [4, 256], strides = [1, 1]} : vector<8x256xf32> to vector<4x256xf32>
    %70 = vector.extract_strided_slice %68 {offsets = [4, 0], sizes = [4, 256], strides = [1, 1]} : vector<8x256xf32> to vector<4x256xf32>
    %71 = arith.maximumf %69, %70 : vector<4x256xf32>
    %72 = vector.extract_strided_slice %71 {offsets = [0, 0], sizes = [4, 128], strides = [1, 1]} : vector<4x256xf32> to vector<4x128xf32>
    %73 = vector.extract_strided_slice %71 {offsets = [0, 128], sizes = [4, 128], strides = [1, 1]} : vector<4x256xf32> to vector<4x128xf32>
    %74 = arith.maximumf %72, %73 : vector<4x128xf32>
    %c0_52 = arith.constant 0 : index
    %c0_53 = arith.constant 0 : index
    %c0_54 = arith.constant 0 : index
    %75 = vector.load %arg7[%c0_52, %c0_53, %c0_54] : memref<2x2x4xbf16, #tpu.memory_space<vmem>>, vector<1x2x4xbf16>
    %76 = vector.shape_cast %75 : vector<1x2x4xbf16> to vector<2x4xbf16>
    %77 = arith.truncf %74 : vector<4x128xf32> to vector<4x128xbf16>
    %cst_55 = arith.constant dense<0.000000e+00> : vector<2x128xf32>
    %78 = tpu.matmul %76, %77, %cst_55 {dimension_numbers = #tpu.dot_dimension_numbers<[1], [0], [0], [1], [0, 0, 1, 1], [], []>} : vector<2x4xbf16>, vector<4x128xbf16>, vector<2x128xf32> -> vector<2x128xf32>
    %c0_56 = arith.constant 0 : index
    %c0_57 = arith.constant 0 : index
    %c0_58 = arith.constant 0 : index
    %79 = vector.load %arg8[%c0_56, %c0_57, %c0_58] : memref<2x128x240xbf16, #tpu.memory_space<vmem>>, vector<1x128x240xbf16>
    %80 = vector.shape_cast %79 : vector<1x128x240xbf16> to vector<128x240xbf16>
    %81 = arith.truncf %78 : vector<2x128xf32> to vector<2x128xbf16>
    %cst_59 = arith.constant dense<0.000000e+00> : vector<2x240xf32>
    %82 = tpu.matmul %81, %80, %cst_59 {dimension_numbers = #tpu.dot_dimension_numbers<[1], [0], [0], [1], [0, 0, 1, 1], [], []>} : vector<2x128xbf16>, vector<128x240xbf16>, vector<2x240xf32> -> vector<2x240xf32>
    %c1_60 = arith.constant 1 : index
    %c0_61 = arith.constant 0 : index
    %c0_62 = arith.constant 0 : index
    %83 = vector.load %arg7[%c1_60, %c0_61, %c0_62] : memref<2x2x4xbf16, #tpu.memory_space<vmem>>, vector<1x2x4xbf16>
    %84 = vector.shape_cast %83 : vector<1x2x4xbf16> to vector<2x4xbf16>
    %85 = arith.truncf %74 : vector<4x128xf32> to vector<4x128xbf16>
    %cst_63 = arith.constant dense<0.000000e+00> : vector<2x128xf32>
    %86 = tpu.matmul %84, %85, %cst_63 {dimension_numbers = #tpu.dot_dimension_numbers<[1], [0], [0], [1], [0, 0, 1, 1], [], []>} : vector<2x4xbf16>, vector<4x128xbf16>, vector<2x128xf32> -> vector<2x128xf32>
    %c1_64 = arith.constant 1 : index
    %c0_65 = arith.constant 0 : index
    %c0_66 = arith.constant 0 : index
    %87 = vector.load %arg8[%c1_64, %c0_65, %c0_66] : memref<2x128x240xbf16, #tpu.memory_space<vmem>>, vector<1x128x240xbf16>
    %88 = vector.shape_cast %87 : vector<1x128x240xbf16> to vector<128x240xbf16>
    %89 = arith.truncf %86 : vector<2x128xf32> to vector<2x128xbf16>
    %cst_67 = arith.constant dense<0.000000e+00> : vector<2x240xf32>
    %90 = tpu.matmul %89, %88, %cst_67 {dimension_numbers = #tpu.dot_dimension_numbers<[1], [0], [0], [1], [0, 0, 1, 1], [], []>} : vector<2x128xbf16>, vector<128x240xbf16>, vector<2x240xf32> -> vector<2x240xf32>
    %91 = arith.addf %82, %90 : vector<2x240xf32>
    %c0_68 = arith.constant 0 : index
    %c0_69 = arith.constant 0 : index
    %92 = vector.load %arg9[%c0_68, %c0_69] : memref<1x240xf32, #tpu.memory_space<vmem>>, vector<1x240xf32>
    %93 = vector.broadcast %92 : vector<1x240xf32> to vector<2x240xf32>
    %94 = arith.addf %91, %93 : vector<2x240xf32>
    %cst_70 = arith.constant 0.000000e+00 : f32
    %95 = vector.broadcast %cst_70 : f32 to vector<2x240xf32>
    %96 = arith.maximumf %94, %95 : vector<2x240xf32>
    %c0_71 = arith.constant 0 : index
    %c0_72 = arith.constant 0 : index
    %97 = vector.load %arg10[%c0_71, %c0_72] : memref<240x168xbf16, #tpu.memory_space<vmem>>, vector<240x168xbf16>
    %98 = arith.truncf %96 : vector<2x240xf32> to vector<2x240xbf16>
    %cst_73 = arith.constant dense<0.000000e+00> : vector<2x168xf32>
    %99 = tpu.matmul %98, %97, %cst_73 {dimension_numbers = #tpu.dot_dimension_numbers<[1], [0], [0], [1], [0, 0, 1, 1], [], []>} : vector<2x240xbf16>, vector<240x168xbf16>, vector<2x168xf32> -> vector<2x168xf32>
    %c0_74 = arith.constant 0 : index
    %c0_75 = arith.constant 0 : index
    %100 = vector.load %arg11[%c0_74, %c0_75] : memref<1x168xf32, #tpu.memory_space<vmem>>, vector<1x168xf32>
    %101 = vector.broadcast %100 : vector<1x168xf32> to vector<2x168xf32>
    %102 = arith.addf %99, %101 : vector<2x168xf32>
    %cst_76 = arith.constant 0.000000e+00 : f32
    %103 = vector.broadcast %cst_76 : f32 to vector<2x168xf32>
    %104 = arith.maximumf %102, %103 : vector<2x168xf32>
    %c0_77 = arith.constant 0 : index
    %c0_78 = arith.constant 0 : index
    %105 = vector.load %arg12[%c0_77, %c0_78] : memref<168x20xbf16, #tpu.memory_space<vmem>>, vector<168x20xbf16>
    %106 = arith.truncf %104 : vector<2x168xf32> to vector<2x168xbf16>
    %cst_79 = arith.constant dense<0.000000e+00> : vector<2x20xf32>
    %107 = tpu.matmul %106, %105, %cst_79 {dimension_numbers = #tpu.dot_dimension_numbers<[1], [0], [0], [1], [0, 0, 1, 1], [], []>} : vector<2x168xbf16>, vector<168x20xbf16>, vector<2x20xf32> -> vector<2x20xf32>
    %c0_80 = arith.constant 0 : index
    %c0_81 = arith.constant 0 : index
    %108 = vector.load %arg13[%c0_80, %c0_81] : memref<1x20xf32, #tpu.memory_space<vmem>>, vector<1x20xf32>
    %109 = vector.broadcast %108 : vector<1x20xf32> to vector<2x20xf32>
    %110 = arith.addf %107, %109 : vector<2x20xf32>
    %111 = vector.extract_strided_slice %110 {offsets = [0, 0], sizes = [2, 10], strides = [1, 1]} : vector<2x20xf32> to vector<2x10xf32>
    %cst_82 = arith.constant dense<0xFF800000> : vector<2xf32>
    %112 = vector.multi_reduction <maximumf>, %111, %cst_82 [1] : vector<2x10xf32> to vector<2xf32>
    %113 = vector.shape_cast %112 : vector<2xf32> to vector<2x1xf32>
    %114 = vector.broadcast %113 : vector<2x1xf32> to vector<2x10xf32>
    %115 = arith.subf %111, %114 : vector<2x10xf32>
    %116 = math.exp %115 : vector<2x10xf32>
    %cst_83 = arith.constant dense<0.000000e+00> : vector<2xf32>
    %117 = vector.multi_reduction <add>, %116, %cst_83 [1] : vector<2x10xf32> to vector<2xf32>
    %118 = vector.shape_cast %117 : vector<2xf32> to vector<2x1xf32>
    %119 = vector.broadcast %118 : vector<2x1xf32> to vector<2x10xf32>
    %120 = arith.divf %116, %119 : vector<2x10xf32>
    %121 = vector.extract_strided_slice %110 {offsets = [0, 10], sizes = [2, 10], strides = [1, 1]} : vector<2x20xf32> to vector<2x10xf32>
    %cst_84 = arith.constant dense<0xFF800000> : vector<2xf32>
    %122 = vector.multi_reduction <maximumf>, %121, %cst_84 [1] : vector<2x10xf32> to vector<2xf32>
    %123 = vector.shape_cast %122 : vector<2xf32> to vector<2x1xf32>
    %124 = vector.broadcast %123 : vector<2x1xf32> to vector<2x10xf32>
    %125 = arith.subf %121, %124 : vector<2x10xf32>
    %126 = math.exp %125 : vector<2x10xf32>
    %cst_85 = arith.constant dense<0.000000e+00> : vector<2xf32>
    %127 = vector.multi_reduction <add>, %126, %cst_85 [1] : vector<2x10xf32> to vector<2xf32>
    %128 = vector.shape_cast %127 : vector<2xf32> to vector<2x1xf32>
    %129 = vector.broadcast %128 : vector<2x1xf32> to vector<2x10xf32>
    %130 = arith.divf %126, %129 : vector<2x10xf32>
    %c0_86 = arith.constant 0 : index
    %c0_87 = arith.constant 0 : index
    %131 = vector.load %arg20[%c0_86, %c0_87] : memref<2x10xf32, #tpu.memory_space<vmem>>, vector<2x10xf32>
    tpu.vector_store %arg20[%c0_86, %c0_87], %120 {strides = array<i32>} : memref<2x10xf32, #tpu.memory_space<vmem>>, vector<2x10xf32>,
    %c0_88 = arith.constant 0 : index
    %c0_89 = arith.constant 0 : index
    %132 = vector.load %arg21[%c0_88, %c0_89] : memref<2x10xf32, #tpu.memory_space<vmem>>, vector<2x10xf32>
    tpu.vector_store %arg21[%c0_88, %c0_89], %130 {strides = array<i32>} : memref<2x10xf32, #tpu.memory_space<vmem>>, vector<2x10xf32>,
    %133 = tpu.concatenate %120, %130 in 1 : vector<2x10xf32>, vector<2x10xf32> -> vector<2x20xf32>
    %c0_90 = arith.constant 0 : index
    %c0_91 = arith.constant 0 : index
    %134 = vector.load %arg14[%c0_90, %c0_91] : memref<20x200xbf16, #tpu.memory_space<vmem>>, vector<20x200xbf16>
    %135 = arith.truncf %133 : vector<2x20xf32> to vector<2x20xbf16>
    %cst_92 = arith.constant dense<0.000000e+00> : vector<2x200xf32>
    %136 = tpu.matmul %135, %134, %cst_92 {dimension_numbers = #tpu.dot_dimension_numbers<[1], [0], [0], [1], [0, 0, 1, 1], [], []>} : vector<2x20xbf16>, vector<20x200xbf16>, vector<2x200xf32> -> vector<2x200xf32>
    %c0_93 = arith.constant 0 : index
    %c0_94 = arith.constant 0 : index
    %137 = vector.load %arg15[%c0_93, %c0_94] : memref<1x200xf32, #tpu.memory_space<vmem>>, vector<1x200xf32>
    %138 = vector.broadcast %137 : vector<1x200xf32> to vector<2x200xf32>
    %139 = arith.addf %136, %138 : vector<2x200xf32>
    %cst_95 = arith.constant 0.000000e+00 : f32
    %140 = vector.broadcast %cst_95 : f32 to vector<2x200xf32>
    %141 = arith.maximumf %139, %140 : vector<2x200xf32>
    %c0_96 = arith.constant 0 : index
    %c0_97 = arith.constant 0 : index
    %142 = vector.load %arg16[%c0_96, %c0_97] : memref<200x84xbf16, #tpu.memory_space<vmem>>, vector<200x84xbf16>
    %143 = arith.truncf %141 : vector<2x200xf32> to vector<2x200xbf16>
    %cst_98 = arith.constant dense<0.000000e+00> : vector<2x84xf32>
    %144 = tpu.matmul %143, %142, %cst_98 {dimension_numbers = #tpu.dot_dimension_numbers<[1], [0], [0], [1], [0, 0, 1, 1], [], []>} : vector<2x200xbf16>, vector<200x84xbf16>, vector<2x84xf32> -> vector<2x84xf32>
    %c0_99 = arith.constant 0 : index
    %c0_100 = arith.constant 0 : index
    %145 = vector.load %arg17[%c0_99, %c0_100] : memref<1x84xf32, #tpu.memory_space<vmem>>, vector<1x84xf32>
    %146 = vector.broadcast %145 : vector<1x84xf32> to vector<2x84xf32>
    %147 = arith.addf %144, %146 : vector<2x84xf32>
    %cst_101 = arith.constant 0.000000e+00 : f32
    %148 = vector.broadcast %cst_101 : f32 to vector<2x84xf32>
    %149 = arith.maximumf %147, %148 : vector<2x84xf32>
    %c0_102 = arith.constant 0 : index
    %c0_103 = arith.constant 0 : index
    %150 = vector.load %arg18[%c0_102, %c0_103] : memref<84x1xbf16, #tpu.memory_space<vmem>>, vector<84x1xbf16>
    %151 = arith.truncf %149 : vector<2x84xf32> to vector<2x84xbf16>
    %cst_104 = arith.constant dense<0.000000e+00> : vector<2x1xf32>
    %152 = tpu.matmul %151, %150, %cst_104 {dimension_numbers = #tpu.dot_dimension_numbers<[1], [0], [0], [1], [0, 0, 1, 1], [], []>} : vector<2x84xbf16>, vector<84x1xbf16>, vector<2x1xf32> -> vector<2x1xf32>
    %c0_105 = arith.constant 0 : index
    %c0_106 = arith.constant 0 : index
    %153 = vector.load %arg19[%c0_105, %c0_106] : memref<1x1xf32, #tpu.memory_space<vmem>>, vector<1x1xf32>
    %154 = vector.broadcast %153 : vector<1x1xf32> to vector<2x1xf32>
    %155 = arith.addf %152, %154 : vector<2x1xf32>
    %cst_107 = arith.constant 0.000000e+00 : f32
    %156 = vector.broadcast %cst_107 : f32 to vector<2x1xf32>
    %157 = arith.subf %156, %155 : vector<2x1xf32>
    %158 = math.exp %157 : vector<2x1xf32>
    %cst_108 = arith.constant 1.000000e+00 : f32
    %159 = vector.broadcast %cst_108 : f32 to vector<2x1xf32>
    %160 = arith.addf %159, %158 : vector<2x1xf32>
    %cst_109 = arith.constant 1.000000e+00 : f32
    %161 = vector.broadcast %cst_109 : f32 to vector<2x1xf32>
    %162 = arith.divf %161, %160 : vector<2x1xf32>
    %c0_110 = arith.constant 0 : index
    %c0_111 = arith.constant 0 : index
    %163 = vector.load %arg22[%c0_110, %c0_111] : memref<2x1xf32, #tpu.memory_space<vmem>>, vector<2x1xf32>
    tpu.vector_store %arg22[%c0_110, %c0_111], %162 {strides = array<i32>} : memref<2x1xf32, #tpu.memory_space<vmem>>, vector<2x1xf32>,
    return
  }
}

</mosaic_0001>

<bundles_post_ra>
// kernel: aloss_lenet5_forward.1
= control target key start
LH: loop header
LB: loop body
LE: loop exit
PB: predicated region body
PF: predicated region fallthrough
CT: control target
= control target key end

     0   :  { %s4493_s0 = inlined_call_operand.vmem [shape: f32[28,28], index: 0, kind: input, shape index: {}]   ;;  %s4494_s1 = inlined_call_operand.vmem [shape: bf16[3,24,28], index: 1, kind: input, shape index: {}]   ;;  %s4495_s2 = inlined_call_operand.vmem [shape: bf16[3,28,384], index: 2, kind: input, shape index: {}]   ;;  %s4496_s3 = inlined_call_operand.vmem [shape: f32[1,384], index: 3, kind: input, shape index: {}]   ;;  %s4497_s4 = inlined_call_operand.vmem [shape: bf16[3,8,12], index: 4, kind: input, shape index: {}]   ;;  %s4498_s5 = inlined_call_operand.vmem [shape: bf16[3,192,256], index: 5, kind: input, shape index: {}]   ;;  %s4499_s6 = inlined_call_operand.vmem [shape: f32[1,256], index: 6, kind: input, shape index: {}]   ;;  %s4500_s7 = inlined_call_operand.vmem [shape: bf16[2,2,4], index: 7, kind: input, shape index: {}]   ;;  %s4501_s8 = inlined_call_operand.vmem [shape: bf16[2,128,240], index: 8, kind: input, shape index: {}]   ;;  %s4502_s9 = inlined_call_operand.vmem [shape: f32[1,240], index: 9, kind: input, shape index: {}]   ;;  %s4503_s10 = inlined_call_operand.vmem [shape: bf16[240,168], index: 10, kind: input, shape index: {}]   ;;  %s4504_s11 = inlined_call_operand.vmem [shape: f32[1,168], index: 11, kind: input, shape index: {}]   ;;  %s4505_s12 = inlined_call_operand.vmem [shape: bf16[168,20], index: 12, kind: input, shape index: {}]   ;;  %s4506_s13 = inlined_call_operand.vmem [shape: f32[1,20], index: 13, kind: input, shape index: {}]   ;;  %s4507_s14 = inlined_call_operand.vmem [shape: bf16[20,200], index: 14, kind: input, shape index: {}]   ;;  %s4508_s15 = inlined_call_operand.vmem [shape: f32[1,200], index: 15, kind: input, shape index: {}]   ;;  %s4509_s16 = inlined_call_operand.vmem [shape: bf16[200,84], index: 16, kind: input, shape index: {}]   ;;  %s4510_s17 = inlined_call_operand.vmem [shape: f32[1,84], index: 17, kind: input, shape index: {}]   ;;  %s4511_s18 = inlined_call_operand.vmem [shape: bf16[84,1], index: 18, kind: input, shape index: {}]   ;;  %s4512_s19 = inlined_call_operand.<no memory space> [shape: f32[1,1], index: 19, kind: input, shape index: {}]   ;;  %s4513_s20 = inlined_call_operand.hbm [shape: f32[2,10], index: 20, kind: output, shape index: {0}]   ;;  %s4514_s21 = inlined_call_operand.hbm [shape: f32[2,10], index: 21, kind: output, shape index: {1}]   ;;  %s4515_s22 = inlined_call_operand.vmem [shape: f32[2,1], index: 22, kind: output, shape index: {2}]  }
   0x1   :  { %4521 = sst [smem:[#allocation9_spill]] %s4493_s0  ;;  %v28_v0 = vstv %s4512_s19 }
   0x2   :  { %4522 = sst [smem:[#allocation10_spill]] %s4494_s1  ;;  %29 = vst [vmem:[#allocation2] sm:$0x1] %v28_v0 }
   0x3   :  { %4523 = sst [smem:[#allocation11_spill]] %s4495_s2 }
   0x4   :  { %4524 = sst [smem:[#allocation12_spill]] %s4496_s3 }
   0x5   :  { %4525 = sst [smem:[#allocation13_spill]] %s4497_s4 }
   0x6   :  { %4526 = sst [smem:[#allocation14_spill]] %s4498_s5 }
   0x7   :  { %4527 = sst [smem:[#allocation15_spill]] %s4499_s6 }
   0x8   :  { %30 = vsyncpa [#allocation4], 0  ;;  %s4528_s4 = sld [smem:[#allocation9_spill]]  ;;  %vm90_vm0 = vcmask 228352   ;;  %vm97_vm1 = vcmask 1045504   ;;  %s4529_s26 = sld [smem:[#allocation10_spill]] }
   0xe   :  { %v73_v1 = vld [vmem:[%s4528_s4] sm:$0xff]  ;;  %v74_v2 = vld [vmem:[%s4528_s4 + $0x8] sm:$0xff]  ;;  %v75_v3 = vld [vmem:[%s4528_s4 + $0x10] sm:$0xff] }
   0xf   :  { %v3691_v4 = vpack.c.bf16 %v74_v2, %v73_v1  ;;  %v76_v5 = vld [vmem:[%s4528_s4 + $0x18] sm:$0xf]  ;;  %v3231_v7 = vld [vmem:[%s4529_s26] sm:$0xff]   ;;  %v3232_v9 = vld [vmem:[%s4529_s26 + $0x8] ss:$0 sps:$4 sm:$0xff]  }
  0x10   :  { %v3696_v6 = vpack.c.bf16 %v76_v5, %v75_v3  ;;  %3128 = vmatprep.mubr.msk.bf16.mxu0 %vm90_vm0, %v3231_v7  ;;  %v3233_v10 = vld [vmem:[%s4529_s26 + $0xc] sm:$0xff]   ;;  %v3234_v11 = vld [vmem:[%s4529_s26 + $0x14] ss:$0 sps:$4 sm:$0xff]  }
  0x11   :  { %3124 = vmatprep.subr.bf16.mxu0 %v3691_v4 }
  0x12   :  { %3125 = vmatpush3.bf16.msra.mxu0 %v3691_v4  ;;  %v3708_v8 = vsel %vm97_vm1, %v3696_v6, 0 }
  0x13   :  { %3208 = vmatprep.subr.msk.bf16.mxu0 %vm97_vm1, %v3696_v6 }
  0x16   :  { %3127 = vmatpush3.bf16.msra.mxu0 %v3708_v8 }
  0x17   :  { %3132 = vmatprep.subr.bf16.mxu0 %v3691_v4 }
  0x19   :  { %3129 = vmatmul.mubr.msk.bf16.vlgmr.msra.gmra.mrb[0].mxu0 %vm90_vm0, %v3232_v9 }
  0x1a   :  { %3133 = vmatpush3.bf16.msra.mxu0 %v3691_v4  ;;  %3136 = vmatprep.mubr.msk.bf16.mxu0 %vm90_vm0, %v3233_v10 }
  0x1b   :  { %3209 = vmatprep.subr.msk.bf16.mxu0 %vm97_vm1, %v3696_v6 }
  0x1e   :  { %3135 = vmatpush3.bf16.msra.mxu0 %v3708_v8 }
  0x21   :  { %3137 = vmatmul.mubr.msk.bf16.vlgmr.msra.gmra.mrb[4].mxu0 %vm90_vm0, %v3234_v11 }
  0x22   :  { %31 = vsyncpa [#allocation6], 0  ;;  %s4530_s23 = sld [smem:[#allocation11_spill]]  ;;  %v3557_v20 = vmov 0   ;;  %v3251_v40 = vld [vmem:[%s4529_s26 + $0x18] sm:$0xff]   ;;  %s4531_s29 = sld [smem:[#allocation14_spill]] }
  0x23   :  { %312 = vmatprep.mubr.bf16.mxu0 %v3557_v20  ;;  %v3252_v42 = vld [vmem:[%s4529_s26 + $0x20] ss:$0 sps:$4 sm:$0xff]   ;;  %s4532_s24 = sld [smem:[#allocation12_spill]]  ;;  %vm792_vm2 = vcmask 1043456   ;;  %s3558_s5 = smov 64   ;;  %vm826_vm3 = vcmask 523264  }
  0x24   :  { %s4533_s6 = sld [smem:[#allocation13_spill]]  ;;  %vm840_vm4 = vcmask 97280   ;;  %vm3560_vm5 = vmmov 0   ;;  %s4534_s19 = sld [smem:[#allocation15_spill]]  ;;  %vm1588_vm6 = vcmask 1041408   ;;  %vm1584_vm7 = vcmask 31744  }
  0x25   :  { %vm2164_vm8 = vcmask 916480   ;;  %vm2304_vm9 = vcmask 326656   ;;  %vm2363_vm10 = vcmask 156752   ;;  %vm2351_vm11 = vcmask 74752  }
  0x26   :  { %vm2385_vm12 = vcmask 80896   ;;  %vm2418_vm13 = vcmask 162816   ;;  %vm2580_vm14 = vcmask 588800   ;;  %vm2680_vm15 = vcmask 687104  }
  0x28   :  { %v3235_v12 = vld [vmem:[%s4530_s23 + $0x30] ss:$12 sps:$4 sm:$0xff]   ;;  %v3237_v13 = vld [vmem:[%s4530_s23 + $0x34] ss:$12 sps:$4 sm:$0xff]   ;;  %v3238_v14 = vld [vmem:[%s4530_s23 + $0x38] ss:$12 sps:$4 sm:$0xff]  }
  0x29   :  { %280 = vmatprep.subr.bf16.mxu0 %v3237_v13  ;;  %3140 = vmatprep.subr.bf16.mxu1 %v3238_v14  ;;  %v3239_v15 = vld [vmem:[%s4530_s23 + $0x4c] ss:$12 sps:$4 sm:$0x3f]   ;;  %v3241_v16 = vld [vmem:[%s4530_s23 + $0x48] ss:$12 sps:$4 sm:$0x3f]  }
  0x2a   :  { %281 = vmatpush1.bf16.msra.mxu0 %v3235_v12  ;;  %3141 = vmatpush3.bf16.msra.mxu1 %v3238_v14  ;;  %v3242_v17 = vld [vmem:[%s4530_s23 + $0x50] ss:$12 sps:$4 sm:$0x3f]   ;;  %v272_v18 = vsel %vm97_vm1, %v3241_v16, 0  ;;  %v3243_v21 = vld [vmem:[%s4530_s23 + $0x8] ss:$12 sps:$4 sm:$0xff]  }
  0x2b   :  { %2792 = vmatprep.subr.msk.bf16.mxu0 %vm97_vm1, %v3239_v15  ;;  %3210 = vmatprep.subr.msk.bf16.mxu1 %vm97_vm1, %v3242_v17  ;;  %v278_v19 = vsel %vm97_vm1, %v3242_v17, 0  ;;  %v3247_v22 = vld [vmem:[%s4530_s23 + $0x4] ss:$12 sps:$4 sm:$0xff]   ;;  %v3244_v34 = vld [vmem:[%s4530_s23 + $0x20] ss:$12 sps:$4 sm:$0x3f]  }
  0x2c   :  { %v3245_v35 = vld [vmem:[%s4530_s23] ss:$12 sps:$4 sm:$0xff]   ;;  %v3248_v36 = vld [vmem:[%s4530_s23 + $0x1c] ss:$12 sps:$4 sm:$0x3f]   ;;  %v421_v38 = vsel %vm97_vm1, %v3244_v34, 0 }
  0x2d   :  { %v3250_v37 = vld [vmem:[%s4530_s23 + $0x18] ss:$12 sps:$4 sm:$0x3f]   ;;  %v3253_v43 = vld [vmem:[%s4530_s23 + $0x60] ss:$12 sps:$4 sm:$0xff]  }
  0x2e   :  { %283 = vmatpush1.bf16.msra.mxu0 %v272_v18  ;;  %3143 = vmatpush3.bf16.msra.mxu1 %v278_v19  ;;  %v415_v39 = vsel %vm97_vm1, %v3250_v37, 0  ;;  %v3255_v44 = vld [vmem:[%s4530_s23 + $0x64] ss:$12 sps:$4 sm:$0xff]   ;;  %v3256_v45 = vld [vmem:[%s4530_s23 + $0x68] ss:$12 sps:$4 sm:$0xff]  }
  0x2f   :  { %3148 = vmatprep.subr.bf16.mxu1 %v3243_v21  ;;  %423 = vmatprep.subr.bf16.mxu0 %v3247_v22  ;;  %v3257_v46 = vld [vmem:[%s4530_s23 + $0x7c] ss:$12 sps:$4 sm:$0x3f]   ;;  %v3259_v47 = vld [vmem:[%s4530_s23 + $0x78] ss:$12 sps:$4 sm:$0x3f]  }
  0x30   :  { %v3260_v48 = vld [vmem:[%s4530_s23 + $0x80] ss:$12 sps:$4 sm:$0x3f]   ;;  %v635_v49 = vsel %vm97_vm1, %v3259_v47, 0  ;;  %v3266_v16 = vld [vmem:[%s4531_s29 + $0xd4] ss:$8 sps:$4 sm:$0xff]  }
  0x31   :  { %v641_v50 = vsel %vm97_vm1, %v3260_v48, 0  ;;  %v3261_v14 = vld [vmem:[%s4531_s29 + $0xc0] ss:$8 sps:$4 sm:$0xff]   ;;  %v3263_v15 = vld [vmem:[%s4531_s29 + $0xc4] ss:$8 sps:$4 sm:$0xff]  }
  0x32   :  { %v3264_v17 = vld [vmem:[%s4531_s29 + $0xd0] ss:$8 sps:$4 sm:$0xff]   ;;  %v3269_v18 = vld [vmem:[%s4531_s29 + $0xe4] ss:$8 sps:$4 sm:$0xff]   ;;  %v3267_v19 = vld [vmem:[%s4531_s29 + $0xe0] ss:$8 sps:$4 sm:$0xff]  }
  0x33   :  { %v3270_v22 = vld [vmem:[%s4531_s29 + $0xf0] ss:$8 sps:$4 sm:$0xff]  }
  0xec   :  { %v3130_v23 = vpop.f32.mrb[0].mxu0 }
  0xed   :  { %v135_v24 = vpop.f32.mrb[1].mxu0  ;;  %v158_v41 = vpack.c.bf16 %v3130_v23, %v3130_v23  ;;  %v3275_v23 = vld [vmem:[%s4531_s29 + $0x104] ss:$8 sps:$4 sm:$0xff]  }
  0xee   :  { %v3131_v25 = vpop.f32.mrb[2].mxu0 }
  0xef   :  { %v138_v26 = vpop.f32.mrb[3].mxu0  ;;  %v3278_v25 = vld [vmem:[%s4531_s29 + $0x114] ss:$8 sps:$4 sm:$0xff]  }
  0xf0   :  { %v157_v27 = vpack.c.bf16 %v138_v26, %v135_v24  ;;  %v3273_v24 = vld [vmem:[%s4531_s29 + $0x100] ss:$8 sps:$4 sm:$0xff]   ;;  %v3276_v26 = vld [vmem:[%s4531_s29 + $0x110] ss:$8 sps:$4 sm:$0xff]  }
  0xf4   :  { %v3138_v28 = vpop.f32.mrb[4].mxu0 }
  0xf5   :  { %v211_v29 = vpop.f32.mrb[5].mxu0  ;;  %v235_v33 = vpack.c.bf16 %v3138_v28, %v3138_v28  ;;  %v3279_v28 = vld [vmem:[%s4531_s29 + $0x120] ss:$8 sps:$4 sm:$0xff]  }
  0xf6   :  { %v3139_v30 = vpop.f32.mrb[6].mxu0 }
  0xf7   :  { %v214_v31 = vpop.f32.mrb[7].mxu0  ;;  %v3282_v30 = vld [vmem:[%s4531_s29 + $0x130] ss:$8 sps:$4 sm:$0xff]  }
  0xf8   :  { %v234_v32 = vpack.c.bf16 %v214_v31, %v211_v29  ;;  %v3284_v29 = vld [vmem:[%s4531_s29 + $0x134] ss:$8 sps:$4 sm:$0xff]   ;;  %v3287_v31 = vld [vmem:[%s4531_s29 + $0x144] ss:$8 sps:$4 sm:$0xff]  }
  0xfa   :  { %2793 = vmatmul.mubr.msk.bf16.vlgmr.msra.gmra.mrb[8].mxu0 %vm90_vm0, %v234_v32  ;;  %3144 = vmatprep.mubr.msk.bf16.mxu1 %vm90_vm0, %v234_v32  ;;  %v3285_v32 = vld [vmem:[%s4531_s29 + $0x140] ss:$8 sps:$4 sm:$0xff]  }
  0xfb   :  { %3145 = vmatmul.mubr.msk.bf16.vlgmr.msra.gmra.mrb[0].mxu1 %vm90_vm0, %v235_v33  ;;  %322 = vmatprep.mubr.bf16.mxu0 %v3557_v20 }
  0xfc   :  { %3149 = vmatpush3.bf16.msra.mxu1 %v3243_v21  ;;  %3152 = vmatprep.mubr.msk.bf16.mxu1 %vm90_vm0, %v157_v27  ;;  %v3272_v21 = vld [vmem:[%s4531_s29 + $0xf4] ss:$8 sps:$4 sm:$0xff]  }
  0xfd   :  { %3211 = vmatprep.subr.msk.bf16.mxu1 %vm97_vm1, %v3244_v34  ;;  %424 = vmatpush1.bf16.msra.mxu0 %v3245_v35 }
  0xfe   :  { %2803 = vmatprep.subr.msk.bf16.mxu0 %vm97_vm1, %v3248_v36  ;;  %v751_v36 = vld [vmem:[%s4532_s24] sm:$0x7] }
 0x100   :  { %3151 = vmatpush3.bf16.msra.mxu1 %v421_v38 }
 0x101   :  { %3156 = vmatprep.subr.bf16.mxu1 %v3691_v4  ;;  %426 = vmatpush1.bf16.msra.mxu0 %v415_v39 }
 0x102   :  { %2794 = vmatmul.mubr.msk.bf16.gmra.mrb[12].mxu0 %vm90_vm0, %v235_v33  ;;  %643 = vmatprep.subr.bf16.mxu0 %v3255_v44  ;;  %v753_v33 = vlaneseq }
 0x103   :  { %3153 = vmatmul.mubr.msk.bf16.vlgmr.msra.gmra.mrb[4].mxu1 %vm90_vm0, %v158_v41  ;;  %455 = vmatprep.mubr.bf16.mxu0 %v3557_v20 }
 0x104   :  { %3157 = vmatpush3.bf16.msra.mxu1 %v3691_v4  ;;  %3160 = vmatprep.mubr.msk.bf16.mxu1 %vm90_vm0, %v3251_v40  ;;  %v754_v34 = vshrl.u32 %v753_v33, 7 }
 0x105   :  { %3212 = vmatprep.subr.msk.bf16.mxu1 %vm97_vm1, %v3696_v6 }
 0x106   :  { %v3890_v35 = vsub.s32 0, %v754_v34  ;;  %v763_v37 = vsub.s32 2, %v754_v34  ;;  %v3896_v44 = vsub.s32 1, %v754_v34 }
 0x108   :  { %3159 = vmatpush3.bf16.msra.mxu1 %v3708_v8  ;;  %v756_v38 = vrot.slane %v751_v36, %v3890_v35  ;;  %v764_v40 = vrot.slane %v751_v36, %v763_v37 }
 0x109   :  { %3164 = vmatprep.subr.bf16.mxu1 %v3256_v45 }
 0x10a   :  { %2804 = vmatmul.mubr.msk.bf16.vlgmr.msra.gmra.mrb[8].mxu0 %vm90_vm0, %v157_v27  ;;  %v3281_v27 = vld [vmem:[%s4531_s29 + $0x124] ss:$8 sps:$4 sm:$0xff]  }
 0x10b   :  { %3161 = vmatmul.mubr.msk.bf16.vlgmr.msra.gmra.mrb[8].mxu1 %vm90_vm0, %v3252_v42  ;;  %465 = vmatprep.mubr.bf16.mxu0 %v3557_v20 }
 0x10c   :  { %644 = vmatpush1.bf16.msra.mxu0 %v3253_v43  ;;  %3165 = vmatpush3.bf16.msra.mxu1 %v3256_v45 }
 0x10d   :  { %2829 = vmatprep.subr.msk.bf16.mxu0 %vm97_vm1, %v3257_v46  ;;  %3213 = vmatprep.subr.msk.bf16.mxu1 %vm97_vm1, %v3260_v48 }
 0x110   :  { %646 = vmatpush1.bf16.msra.mxu0 %v635_v49  ;;  %3167 = vmatpush3.bf16.msra.mxu1 %v641_v50 }
 0x111   :  { %1113 = vmatprep.subr.bf16.mxu0 %v3263_v15 }
 0x112   :  { %2805 = vmatmul.mubr.msk.bf16.gmra.mrb[16].mxu0 %vm90_vm0, %v158_v41 }
 0x113   :  { %675 = vmatprep.mubr.bf16.mxu0 %v3557_v20 }
 0x1ce   :  { %v3146_v51 = vpop.f32.mrb[0].mxu1 }
 0x1cf   :  { %v365_v52 = vpop.f32.mrb[1].mxu1 }
 0x1d0   :  { %v3147_v53 = vpop.f32.mrb[2].mxu1 }
 0x1d1   :  { %v368_v54 = vpop.f32.mrb[3].mxu1 }
 0x1d5   :  { %v324_v55 = vpop.f32.mrb[12].mxu0 }
 0x1d6   :  { %v326_v56 = vpop.f32.mrb[13].mxu0  ;;  %v3154_v57 = vpop.f32.mrb[4].mxu1 }
 0x1d7   :  { %v3820_v58 = vadd.f32 %v3154_v57, %v3146_v51  ;;  %v328_v59 = vpop.f32.mrb[14].mxu0  ;;  %v508_v60 = vpop.f32.mrb[5].mxu1 }
 0x1d8   :  { %v3822_v61 = vadd.f32 %v508_v60, %v365_v52  ;;  %v329_v62 = vpop.f32.mrb[15].mxu0  ;;  %v3155_v63 = vpop.f32.mrb[6].mxu1 }
 0x1d9   :  { %v511_v0 = vpop.f32.mrb[7].mxu1 }
 0x1da   :  { %v3824_v1 = vadd.f32 %v511_v0, %v368_v54 }
 0x1de   :  { %v3162_v2 = vpop.f32.mrb[8].mxu1 }
 0x1df   :  { %v574_v3 = vpop.f32.mrb[9].mxu1  ;;  %v598_v7 = vpack.c.bf16 %v3162_v2, %v3162_v2 }
 0x1e0   :  { %v3163_v4 = vpop.f32.mrb[10].mxu1 }
 0x1e1   :  { %v577_v5 = vpop.f32.mrb[11].mxu1 }
 0x1e2   :  { %v597_v6 = vpack.c.bf16 %v577_v5, %v574_v3 }
 0x1e4   :  { %2830 = vmatmul.mubr.msk.bf16.vlgmr.msra.gmra.mrb[8].mxu0 %vm90_vm0, %v597_v6  ;;  %3168 = vmatprep.mubr.msk.bf16.mxu1 %vm90_vm0, %v597_v6 }
 0x1e5   :  { %v467_v8 = vpop.f32.mrb[16].mxu0  ;;  %3169 = vmatmul.mubr.msk.bf16.vlgmr.msra.gmra.mrb[12].mxu1 %vm90_vm0, %v598_v7  ;;  %685 = vmatprep.mubr.bf16.mxu0 %v3557_v20 }
 0x1e6   :  { %v3830_v9 = vadd.f32 %v467_v8, %v324_v55  ;;  %v469_v10 = vpop.f32.mrb[17].mxu0  ;;  %882 = vmatprep.mubr.bf16.mxu1 %v3557_v20  ;;  %1114 = vmatpush1.bf16.msra.mxu0 %v3261_v14  ;;  %v760_v55 = vrot.slane %v751_v36, %v3896_v44 }
 0x1e7   :  { %v3833_v11 = vadd.f32 %v469_v10, %v326_v56  ;;  %v471_v12 = vpop.f32.mrb[18].mxu0  ;;  %1115 = vmatprep.subr.bf16.mxu0 %v3266_v16 }
 0x1e8   :  { %v472_v13 = vpop.f32.mrb[19].mxu0 }
 0x1ea   :  { %1116 = vmatpush1.bf16.msra.mxu0 %v3264_v17 }
 0x1eb   :  { %1117 = vmatprep.subr.bf16.mxu0 %v3269_v18 }
 0x1ec   :  { %2831 = vmatmul.mubr.msk.bf16.gmra.mrb[20].mxu0 %vm90_vm0, %v598_v7 }
 0x1ee   :  { %1118 = vmatpush1.bf16.msra.mxu0 %v3267_v19 }
 0x1ef   :  { %1119 = vmatprep.subr.bf16.mxu0 %v3272_v21 }
 0x1f2   :  { %1120 = vmatpush1.bf16.msra.mxu0 %v3270_v22 }
 0x1f3   :  { %1121 = vmatprep.subr.bf16.mxu0 %v3275_v23 }
 0x1f6   :  { %1122 = vmatpush1.bf16.msra.mxu0 %v3273_v24 }
 0x1f7   :  { %1123 = vmatprep.subr.bf16.mxu0 %v3278_v25 }
 0x1fa   :  { %1124 = vmatpush1.bf16.msra.mxu0 %v3276_v26  ;;  %v3296_v26 = vld [vmem:[%s4531_s29 + $0x174] ss:$8 sps:$4 sm:$0xff]  }
 0x1fb   :  { %1125 = vmatprep.subr.bf16.mxu0 %v3281_v27 }
 0x1fe   :  { %1126 = vmatpush1.bf16.msra.mxu0 %v3279_v28 }
 0x1ff   :  { %1127 = vmatprep.subr.bf16.mxu0 %v3284_v29 }
 0x202   :  { %1128 = vmatpush1.bf16.msra.mxu0 %v3282_v30  ;;  %v3294_v30 = vld [vmem:[%s4531_s29 + $0x170] ss:$8 sps:$4 sm:$0xff]  }
 0x203   :  { %1129 = vmatprep.subr.bf16.mxu0 %v3287_v31 }
 0x206   :  { %1130 = vmatpush1.bf16.msra.mxu0 %v3285_v32 }
 0x2b7   :  { %v677_v39 = vpop.f32.mrb[8].mxu0 }
 0x2b8   :  { %v768_v41 = vadd.f32 %v756_v38, %v677_v39  ;;  %v679_v42 = vpop.f32.mrb[9].mxu0  ;;  %v3170_v43 = vpop.f32.mrb[12].mxu1 }
 0x2b9   :  { %v750_v45 = vadd.f32 %v3170_v43, %v3820_v58  ;;  %v681_v46 = vpop.f32.mrb[10].mxu0  ;;  %v728_v47 = vpop.f32.mrb[13].mxu1  ;;  %v3290_v58 = vld [vmem:[%s4531_s29 + $0x154] ss:$8 sps:$4 sm:$0xff]   ;;  %v769_v15 = vadd.f32 %v760_v55, %v679_v42 }
 0x2ba   :  { %v771_v48 = vadd.f32 %v756_v38, %v681_v46  ;;  %v744_v49 = vadd.f32 %v728_v47, %v3822_v61  ;;  %v683_v50 = vpop.f32.mrb[11].mxu0  ;;  %v3171_v51 = vpop.f32.mrb[14].mxu1  ;;  %1131 = vmatprep.subr.bf16.mxu0 %v3290_v58  ;;  %v777_v23 = vmax.f32 %v768_v41, 0.0  ;;  %v3308_v58 = vld [vmem:[%s4531_s29 + $0x34] ss:$8 sps:$4 sm:$0xff]  }
 0x2bb   :  { %v776_v52 = vadd.f32 %v764_v40, %v750_v45  ;;  %v731_v53 = vpop.f32.mrb[15].mxu1  ;;  %v772_v62 = vadd.f32 %v760_v55, %v683_v50  ;;  %v778_v27 = vmax.f32 %v769_v15, 0.0  ;;  %v3332_v15 = vld [vmem:[%s4531_s29 + $0xb4] ss:$8 sps:$4 sm:$0xff]  }
 0x2bc   :  { %v747_v54 = vadd.f32 %v731_v53, %v3824_v1  ;;  %v770_v60 = vadd.f32 %v764_v40, %v744_v49  ;;  %v3288_v1 = vld [vmem:[%s4531_s29 + $0x150] ss:$8 sps:$4 sm:$0xff]   ;;  %v780_v5 = vmax.f32 %v771_v48, 0.0 }
 0x2bd   :  { %v785_v56 = vmax.f32 %v776_v52, 0.0  ;;  %1132 = vmatpush1.bf16.msra.mxu0 %v3288_v1  ;;  %v781_v13 = vmax.f32 %v772_v62, 0.0  ;;  %v3305_v62 = vld [vmem:[%s4531_s29 + $0x24] ss:$8 sps:$4 sm:$0xff]   ;;  %v3314_v1 = vld [vmem:[%s4531_s29 + $0x54] ss:$8 sps:$4 sm:$0xff]  }
 0x2be   :  { %v773_v57 = vadd.f32 %v764_v40, %v747_v54  ;;  %v779_v12 = vmax.f32 %v770_v60, 0.0  ;;  %v793_v21 = vrot.slane %v780_v5, 4  ;;  %v837_v54 = vld [vmem:[%s4533_s6] sm:$0xf]  ;;  %v3300_v60 = vld [vmem:[%s4531_s29 + $0x10] ss:$8 sps:$4 sm:$0xff]  }
 0x2bf   :  { %v800_v59 = vrot.slane %v785_v56, 4  ;;  %v687_v63 = vpop.f32.mrb[20].mxu0  ;;  %v796_v24 = vrot.slane %v781_v13, 4  ;;  %v2836_v56 = vld [vmem:[%s4533_s6 + $0x4] sm:$0xf] }
 0x2c0   :  { %v782_v0 = vmax.f32 %v773_v57, 0.0  ;;  %v748_v61 = vadd.f32 %v687_v63, %v3830_v9  ;;  %v689_v2 = vpop.f32.mrb[21].mxu0  ;;  %v3293_v9 = vld [vmem:[%s4531_s29 + $0x164] ss:$8 sps:$4 sm:$0xff]   ;;  %v3297_v57 = vld [vmem:[%s4531_s29] ss:$8 sps:$4 sm:$0xff]  }
 0x2c1   :  { %v749_v3 = vadd.f32 %v689_v2, %v3833_v11  ;;  %v691_v4 = vpop.f32.mrb[22].mxu0  ;;  %v3291_v11 = vld [vmem:[%s4531_s29 + $0x160] ss:$8 sps:$4 sm:$0xff]   ;;  %1133 = vmatprep.subr.bf16.mxu0 %v3293_v9 }
 0x2c2   :  { %v799_v6 = vrot.slane %v782_v0, 4  ;;  %v813_v7 = vmax.f32 %v782_v0, %v800_v59  ;;  %v774_v8 = vadd.f32 %v756_v38, %v748_v61  ;;  %v692_v10 = vpop.f32.mrb[23].mxu0  ;;  %1134 = vmatpush1.bf16.msra.mxu0 %v3291_v11  ;;  %v3303_v63 = vld [vmem:[%s4531_s29 + $0x20] ss:$8 sps:$4 sm:$0xff]   ;;  %v3306_v0 = vld [vmem:[%s4531_s29 + $0x30] ss:$8 sps:$4 sm:$0xff]  }
 0x2c3   :  { %v775_v14 = vadd.f32 %v760_v55, %v749_v3  ;;  %1135 = vmatprep.subr.bf16.mxu0 %v3296_v26  ;;  %v3299_v55 = vld [vmem:[%s4531_s29 + $0x4] ss:$8 sps:$4 sm:$0xff]   ;;  %v3309_v2 = vld [vmem:[%s4531_s29 + $0x40] ss:$8 sps:$4 sm:$0xff]   ;;  %v3312_v3 = vld [vmem:[%s4531_s29 + $0x50] ss:$8 sps:$4 sm:$0xff]  }
 0x2c4   :  { %v783_v16 = vmax.f32 %v774_v8, 0.0  ;;  %v801_v17 = vsel %vm792_vm2, %v799_v6, %v800_v59  ;;  %v3302_v59 = vld [vmem:[%s4531_s29 + $0x14] ss:$8 sps:$4 sm:$0xff]   ;;  %v3311_v61 = vld [vmem:[%s4531_s29 + $0x44] ss:$8 sps:$4 sm:$0xff]  }
 0x2c5   :  { %v784_v18 = vmax.f32 %v775_v14, 0.0  ;;  %v810_v19 = vmax.f32 %v779_v12, %v801_v17  ;;  %v3317_v4 = vld [vmem:[%s4531_s29 + $0x64] ss:$8 sps:$4 sm:$0xff]   ;;  %v3320_v6 = vld [vmem:[%s4531_s29 + $0x74] ss:$8 sps:$4 sm:$0xff]  }
 0x2c6   :  { %v794_v22 = vrot.slane %v783_v16, 4  ;;  %1136 = vmatpush1.bf16.msra.mxu0 %v3294_v30  ;;  %v3323_v8 = vld [vmem:[%s4531_s29 + $0x84] ss:$8 sps:$4 sm:$0xff]   ;;  %v3321_v10 = vld [vmem:[%s4531_s29 + $0x80] ss:$8 sps:$4 sm:$0xff]  }
 0x2c7   :  { %v797_v25 = vrot.slane %v784_v18, 4  ;;  %v3326_v12 = vld [vmem:[%s4531_s29 + $0x94] ss:$8 sps:$4 sm:$0xff]   ;;  %v3329_v14 = vld [vmem:[%s4531_s29 + $0xa4] ss:$8 sps:$4 sm:$0xff]  }
 0x2c8   :  { %v795_v28 = vsel %vm792_vm2, %v793_v21, %v794_v22  ;;  %v811_v29 = vmax.f32 %v780_v5, %v794_v22  ;;  %v3315_v5 = vld [vmem:[%s4531_s29 + $0x60] ss:$8 sps:$4 sm:$0xff]   ;;  %v3330_v16 = vld [vmem:[%s4531_s29 + $0xb0] ss:$8 sps:$4 sm:$0xff]  }
 0x2c9   :  { %v808_v31 = vmax.f32 %v777_v23, %v795_v28  ;;  %v812_v32 = vmax.f32 %v781_v13, %v797_v25  ;;  %v798_v33 = vsel %vm792_vm2, %v796_v24, %v797_v25  ;;  %v3324_v13 = vld [vmem:[%s4531_s29 + $0x90] ss:$8 sps:$4 sm:$0xff]   ;;  %v3327_v9 = vld [vmem:[%s4531_s29 + $0xa0] ss:$8 sps:$4 sm:$0xff]  }
 0x2ca   :  { %v809_v34 = vmax.f32 %v778_v27, %v798_v33  ;;  %v2913_v30 = vld [vmem:[%s4533_s6 + $0x8] sm:$0xf]  ;;  %v3336_v33 = vld [vmem:[%s4531_s29 + $0x190] ss:$8 sps:$4 sm:$0xff]  }
 0x2cb   :  { %v3226_v37 = vpack.i.bf16 %v813_v7, %v812_v32  ;;  %v3318_v7 = vld [vmem:[%s4531_s29 + $0x70] ss:$8 sps:$4 sm:$0xff]  }
 0x2cc   :  { %v3221_v36 = vpack.i.bf16 %v810_v19, %v809_v34 }
 0x2ce   :  { %3222 = vrot.lane.b32.xlu0 %v3221_v36, %s3558_s5  ;;  %v3339_v36 = vld [vmem:[%s4531_s29 + $0x1a0] ss:$8 sps:$4 sm:$0xff]  }
 0x2d2   :  { %3227 = vrot.lane.b32.xlu0 %v3226_v37, %s3558_s5  ;;  %v3344_v37 = vld [vmem:[%s4531_s29 + $0x1b4] ss:$8 sps:$4 sm:$0xff]  }
 0x340   :  { %v3223_v38 = vpop.permute.xlu0 %3222 }
 0x341   :  { %v3225_v39 = vunpack.i.h.bf16 %v3223_v38  ;;  %v3224_v40 = vunpack.i.l.bf16 %v3223_v38  ;;  %v3342_v38 = vld [vmem:[%s4531_s29 + $0x1b0] ss:$8 sps:$4 sm:$0xff]  }
 0x343   :  { %v827_v42 = vsel %vm826_vm3, %v3224_v40, %v3225_v39  ;;  %v834_v46 = vmax.f32 %v809_v34, %v3225_v39  ;;  %v3341_v34 = vld [vmem:[%s4531_s29 + $0x1a4] ss:$8 sps:$4 sm:$0xff]   ;;  %v3345_v40 = vld [vmem:[%s4531_s29 + $0x1c0] ss:$8 sps:$4 sm:$0xff]  }
 0x344   :  { %v3228_v41 = vpop.permute.xlu0 %3227  ;;  %v833_v49 = vmax.f32 %v808_v31, %v827_v42  ;;  %v3333_v31 = vld [vmem:[%s4531_s29 + $0x180] ss:$8 sps:$4 sm:$0xff]   ;;  %v3347_v39 = vld [vmem:[%s4531_s29 + $0x1c4] ss:$8 sps:$4 sm:$0xff]   ;;  %v3348_v42 = vld [vmem:[%s4531_s29 + $0x1d0] ss:$8 sps:$4 sm:$0xff]  }
 0x345   :  { %v3230_v43 = vunpack.i.h.bf16 %v3228_v41  ;;  %v3229_v45 = vunpack.i.l.bf16 %v3228_v41  ;;  %v3350_v41 = vld [vmem:[%s4531_s29 + $0x1d4] ss:$8 sps:$4 sm:$0xff]  }
 0x347   :  { %v836_v47 = vmax.f32 %v812_v32, %v3230_v43  ;;  %v828_v48 = vsel %vm826_vm3, %v3229_v45, %v3230_v43  ;;  %v3338_v32 = vld [vmem:[%s4531_s29 + $0x194] ss:$8 sps:$4 sm:$0xff]   ;;  %v3353_v43 = vld [vmem:[%s4531_s29 + $0x1e4] ss:$8 sps:$4 sm:$0xff]   ;;  %v3351_v45 = vld [vmem:[%s4531_s29 + $0x1e0] ss:$8 sps:$4 sm:$0xff]  }
 0x348   :  { %v835_v50 = vmax.f32 %v811_v29, %v828_v48  ;;  %v3335_v29 = vld [vmem:[%s4531_s29 + $0x184] ss:$8 sps:$4 sm:$0xff]   ;;  %v3357_v48 = vld [vmem:[%s4531_s29 + $0x200] ss:$8 sps:$4 sm:$0xff]  }
 0x349   :  { %v839_v51 = vpack.c.bf16 %v836_v47, %v834_v46  ;;  %v3356_v46 = vld [vmem:[%s4531_s29 + $0x1f4] ss:$8 sps:$4 sm:$0xff]   ;;  %v3354_v47 = vld [vmem:[%s4531_s29 + $0x1f0] ss:$8 sps:$4 sm:$0xff]  }
 0x34a   :  { %v838_v52 = vpack.c.bf16 %v835_v50, %v833_v49  ;;  %v3359_v49 = vld [vmem:[%s4531_s29 + $0x204] ss:$8 sps:$4 sm:$0xff]   ;;  %v3362_v50 = vld [vmem:[%s4531_s29 + $0x214] ss:$8 sps:$4 sm:$0xff]  }
 0x34b   :  { %2834 = vmatprep.subr.msk.bf16.mxu1 %vm97_vm1, %v839_v51  ;;  %2914 = vmatprep.subr.msk.bf16.mxu0 %vm97_vm1, %v839_v51 }
 0x34c   :  { %v3930_v53 = vsel %vm97_vm1, %v838_v52, 0  ;;  %v3363_v52 = vld [vmem:[%s4531_s29 + $0x220] ss:$8 sps:$4 sm:$0xff]  }
 0x34d   :  { %851 = vmatpush1.bf16.msra.mxu1 %v3930_v53 }
 0x34e   :  { %2837 = vmatprep.subr.msk.bf16.mxu1 %vm97_vm1, %v839_v51  ;;  %v3360_v51 = vld [vmem:[%s4531_s29 + $0x210] ss:$8 sps:$4 sm:$0xff]  }
 0x350   :  { %2835 = vmatmul.mubr.msk.bf16.vlgmr.msra.gmra.mrb[16].mxu1 %vm840_vm4, %v837_v54  ;;  %v3368_v54 = vld [vmem:[%s4531_s29 + $0x234] ss:$8 sps:$4 sm:$0xff]  }
 0x351   :  { %923 = vmatpush1.bf16.msra.mxu1 %v3930_v53  ;;  %954 = vmatprep.mubr.bf16.mxu1 %v3557_v20 }
 0x352   :  { %1277 = vmatprep.subr.bf16.mxu1 %v3299_v55  ;;  %v3366_v55 = vld [vmem:[%s4531_s29 + $0x230] ss:$8 sps:$4 sm:$0xff]  }
 0x358   :  { %2838 = vmatmul.mubr.msk.bf16.vlgmr.msra.gmra.mrb[20].mxu1 %vm840_vm4, %v2836_v56 }
 0x359   :  { %1278 = vmatpush1.bf16.msra.mxu1 %v3297_v57 }
 0x35a   :  { %1279 = vmatprep.subr.bf16.mxu1 %v3302_v59 }
 0x35d   :  { %1280 = vmatpush1.bf16.msra.mxu1 %v3300_v60 }
 0x35e   :  { %1281 = vmatprep.subr.bf16.mxu1 %v3305_v62 }
 0x361   :  { %1282 = vmatpush1.bf16.msra.mxu1 %v3303_v63 }
 0x362   :  { %1283 = vmatprep.subr.bf16.mxu1 %v3308_v58 }
 0x365   :  { %1284 = vmatpush1.bf16.msra.mxu1 %v3306_v0 }
 0x366   :  { %1285 = vmatprep.subr.bf16.mxu1 %v3311_v61 }
 0x369   :  { %1286 = vmatpush1.bf16.msra.mxu1 %v3309_v2 }
 0x36a   :  { %1287 = vmatprep.subr.bf16.mxu1 %v3314_v1 }
 0x36d   :  { %1288 = vmatpush1.bf16.msra.mxu1 %v3312_v3 }
 0x36e   :  { %1289 = vmatprep.subr.bf16.mxu1 %v3317_v4 }
 0x371   :  { %1290 = vmatpush1.bf16.msra.mxu1 %v3315_v5 }
 0x372   :  { %1291 = vmatprep.subr.bf16.mxu1 %v3320_v6 }
 0x375   :  { %1292 = vmatpush1.bf16.msra.mxu1 %v3318_v7 }
 0x376   :  { %1293 = vmatprep.subr.bf16.mxu1 %v3323_v8  ;;  %v3559_v8 = vmov 0.0  }
 0x379   :  { %1294 = vmatpush1.bf16.msra.mxu1 %v3321_v10  ;;  %v3369_v10 = vld [vmem:[%s4501_s8] ss:$8 sps:$4 sm:$0xff]  }
 0x37a   :  { %1295 = vmatprep.subr.bf16.mxu1 %v3326_v12  ;;  %v3371_v12 = vld [vmem:[%s4501_s8 + $0x4] ss:$8 sps:$4 sm:$0xff]  }
 0x37d   :  { %1296 = vmatpush1.bf16.msra.mxu1 %v3324_v13  ;;  %v3374_v13 = vld [vmem:[%s4501_s8 + $0x14] ss:$8 sps:$4 sm:$0xff]  }
 0x37e   :  { %1297 = vmatprep.subr.bf16.mxu1 %v3329_v14  ;;  %v3372_v14 = vld [vmem:[%s4501_s8 + $0x10] ss:$8 sps:$4 sm:$0xff]  }
 0x381   :  { %1298 = vmatpush1.bf16.msra.mxu1 %v3327_v9  ;;  %v3380_v9 = vld [vmem:[%s4501_s8 + $0x24] ss:$8 sps:$4 sm:$0xff]  }
 0x382   :  { %1299 = vmatprep.subr.bf16.mxu1 %v3332_v15  ;;  %v3378_v15 = vld [vmem:[%s4501_s8 + $0x20] ss:$8 sps:$4 sm:$0xff]  }
 0x385   :  { %1300 = vmatpush1.bf16.msra.mxu1 %v3330_v16  ;;  %v3386_v16 = vld [vmem:[%s4501_s8 + $0x34] ss:$8 sps:$4 sm:$0xff]  }
 0x386   :  { %3172 = vmatprep.subr.bf16.mxu1 %v3559_v8 }
 0x423   :  { %v884_v17 = vpop.f32.mrb[16].mxu1 }
 0x424   :  { %v886_v11 = vpop.f32.mrb[17].mxu1  ;;  %v915_v21 = vpack.c.bf16 %v884_v17, %v884_v17  ;;  %v3384_v17 = vld [vmem:[%s4501_s8 + $0x30] ss:$8 sps:$4 sm:$0xff]  }
 0x425   :  { %v916_v18 = vpack.c.bf16 %v886_v11, %v886_v11  ;;  %v888_v19 = vpop.f32.mrb[18].mxu1  ;;  %v3392_v11 = vld [vmem:[%s4501_s8 + $0x44] ss:$8 sps:$4 sm:$0xff]  }
 0x426   :  { %v889_v22 = vpop.f32.mrb[19].mxu1  ;;  %v3398_v19 = vld [vmem:[%s4501_s8 + $0x54] ss:$8 sps:$4 sm:$0xff]  }
 0x427   :  { %2912 = vmatprep.mubr.msk.bf16.mxu1 %vm826_vm3, %v916_v18  ;;  %v3390_v18 = vld [vmem:[%s4501_s8 + $0x40] ss:$8 sps:$4 sm:$0xff]   ;;  %v3404_v22 = vld [vmem:[%s4501_s8 + $0x64] ss:$8 sps:$4 sm:$0xff]  }
 0x428   :  { %1310 = vmatmul.mubr.bf16.vlgmr.msra.gmra.mrb[24].mxu1 %v915_v21  ;;  %v3396_v21 = vld [vmem:[%s4501_s8 + $0x50] ss:$8 sps:$4 sm:$0xff]  }
 0x429   :  { %3174 = vmatprep.mubr.msk.bf16.mxu1 %vm3560_vm5, %v3559_v8 }
 0x42b   :  { %v956_v23 = vpop.f32.mrb[20].mxu1 }
 0x42c   :  { %v958_v24 = vpop.f32.mrb[21].mxu1  ;;  %v988_v27 = vpack.c.bf16 %v956_v23, %v956_v23  ;;  %v3402_v23 = vld [vmem:[%s4501_s8 + $0x60] ss:$8 sps:$4 sm:$0xff]  }
 0x42d   :  { %v989_v25 = vpack.c.bf16 %v958_v24, %v958_v24  ;;  %v960_v26 = vpop.f32.mrb[22].mxu1  ;;  %v3410_v24 = vld [vmem:[%s4501_s8 + $0x74] ss:$8 sps:$4 sm:$0xff]  }
 0x42e   :  { %v961_v28 = vpop.f32.mrb[23].mxu1  ;;  %v1557_v26 = vld [vmem:[%s4534_s19] sm:$0x3] }
 0x42f   :  { %2887 = vmatprep.mubr.msk.bf16.mxu0 %vm826_vm3, %v989_v25  ;;  %v3408_v25 = vld [vmem:[%s4501_s8 + $0x70] ss:$8 sps:$4 sm:$0xff]  }
 0x430   :  { %1146 = vmatmul.mubr.bf16.vlgmr.msra.gmra.mrb[24].mxu0 %v988_v27  ;;  %v1562_v27 = vrot.slane %v1557_v26, %v3890_v35 }
 0x431   :  { %1324 = vmatpush1.bf16.msra.mxu0 %v3930_v53  ;;  %1355 = vmatprep.mubr.bf16.mxu0 %v3557_v20  ;;  %v3365_v53 = vld [vmem:[%s4531_s29 + $0x224] ss:$8 sps:$4 sm:$0xff]  }
 0x432   :  { %1514 = vmatprep.subr.bf16.mxu0 %v3335_v29  ;;  %v1566_v29 = vrot.slane %v1557_v26, %v3896_v44  ;;  %v3437_v26 = vld [vmem:[%s4503_s10 + $0x64] ss:$8 sps:$4 sm:$0xff]  }
 0x438   :  { %2915 = vmatmul.mubr.msk.bf16.vlgmr.msra.gmra.mrb[28].mxu0 %vm840_vm4, %v2913_v30 }
 0x439   :  { %1515 = vmatpush1.bf16.msra.mxu0 %v3333_v31 }
 0x43a   :  { %1516 = vmatprep.subr.bf16.mxu0 %v3338_v32 }
 0x43d   :  { %1517 = vmatpush1.bf16.msra.mxu0 %v3336_v33 }
 0x43e   :  { %1518 = vmatprep.subr.bf16.mxu0 %v3341_v34 }
 0x441   :  { %1519 = vmatpush1.bf16.msra.mxu0 %v3339_v36 }
 0x442   :  { %1520 = vmatprep.subr.bf16.mxu0 %v3344_v37 }
 0x445   :  { %1521 = vmatpush1.bf16.msra.mxu0 %v3342_v38 }
 0x446   :  { %1522 = vmatprep.subr.bf16.mxu0 %v3347_v39 }
 0x449   :  { %1523 = vmatpush1.bf16.msra.mxu0 %v3345_v40 }
 0x44a   :  { %1524 = vmatprep.subr.bf16.mxu0 %v3350_v41 }
 0x44d   :  { %1525 = vmatpush1.bf16.msra.mxu0 %v3348_v42 }
 0x44e   :  { %1526 = vmatprep.subr.bf16.mxu0 %v3353_v43 }
 0x451   :  { %1527 = vmatpush1.bf16.msra.mxu0 %v3351_v45 }
 0x452   :  { %1528 = vmatprep.subr.bf16.mxu0 %v3356_v46 }
 0x455   :  { %1529 = vmatpush1.bf16.msra.mxu0 %v3354_v47 }
 0x456   :  { %1530 = vmatprep.subr.bf16.mxu0 %v3359_v49  ;;  %v3377_v49 = vld [vmem:[%s4501_s8 + $0x84] ss:$8 sps:$4 sm:$0xff]  }
 0x459   :  { %1531 = vmatpush1.bf16.msra.mxu0 %v3357_v48  ;;  %v1582_v48 = vld [vmem:[%s4500_s7] sm:$0x1] }
 0x45a   :  { %1532 = vmatprep.subr.bf16.mxu0 %v3362_v50  ;;  %v2966_v50 = vld [vmem:[%s4500_s7 + $0x1] sm:$0x1] }
 0x45d   :  { %1533 = vmatpush1.bf16.msra.mxu0 %v3360_v51  ;;  %v3375_v51 = vld [vmem:[%s4501_s8 + $0x80] ss:$8 sps:$4 sm:$0xff]  }
 0x45e   :  { %1534 = vmatprep.subr.bf16.mxu0 %v3365_v53  ;;  %v3381_v53 = vld [vmem:[%s4501_s8 + $0x90] ss:$8 sps:$4 sm:$0xff]  }
 0x461   :  { %1535 = vmatpush1.bf16.msra.mxu0 %v3363_v52  ;;  %v3383_v52 = vld [vmem:[%s4501_s8 + $0x94] ss:$8 sps:$4 sm:$0xff]  }
 0x462   :  { %1536 = vmatprep.subr.bf16.mxu0 %v3368_v54  ;;  %v3389_v54 = vld [vmem:[%s4501_s8 + $0xa4] ss:$8 sps:$4 sm:$0xff]  }
 0x465   :  { %1537 = vmatpush1.bf16.msra.mxu0 %v3366_v55  ;;  %v3387_v55 = vld [vmem:[%s4501_s8 + $0xa0] ss:$8 sps:$4 sm:$0xff]  }
 0x466   :  { %1913 = vmatprep.subr.bf16.mxu0 %v3371_v12  ;;  %v3417_v12 = vld [vmem:[%s4503_s10] ss:$8 sps:$4 sm:$0xff]  }
 0x4fb   :  { %v1311_v56 = vpop.f32.mrb[24].mxu1 }
 0x4fc   :  { %v1313_v57 = vpop.f32.mrb[25].mxu1 }
 0x4fd   :  { %v1315_v59 = vpop.f32.mrb[26].mxu1 }
 0x4fe   :  { %v1316_v60 = vpop.f32.mrb[27].mxu1  ;;  %v3401_v59 = vld [vmem:[%s4501_s8 + $0xc4] ss:$8 sps:$4 sm:$0xff]  }
 0x4ff   :  { %v3399_v60 = vld [vmem:[%s4501_s8 + $0xc0] ss:$8 sps:$4 sm:$0xff]  }
 0x503   :  { %v1147_v62 = vpop.f32.mrb[24].mxu0 }
 0x504   :  { %v1312_v63 = vadd.f32 %v1311_v56, %v1147_v62  ;;  %v1149_v58 = vpop.f32.mrb[25].mxu0  ;;  %v3395_v56 = vld [vmem:[%s4501_s8 + $0xb4] ss:$8 sps:$4 sm:$0xff]  }
 0x505   :  { %v1314_v0 = vadd.f32 %v1313_v57, %v1149_v58  ;;  %v1151_v61 = vpop.f32.mrb[26].mxu0  ;;  %v3393_v57 = vld [vmem:[%s4501_s8 + $0xb0] ss:$8 sps:$4 sm:$0xff]   ;;  %v3407_v62 = vld [vmem:[%s4501_s8 + $0xd4] ss:$8 sps:$4 sm:$0xff]  }
 0x506   :  { %v1152_v2 = vpop.f32.mrb[27].mxu0  ;;  %v3411_v58 = vld [vmem:[%s4501_s8 + $0xe0] ss:$8 sps:$4 sm:$0xff]   ;;  %v3416_v61 = vld [vmem:[%s4501_s8 + $0xf4] ss:$8 sps:$4 sm:$0xff]  }
 0x507   :  { %v3414_v2 = vld [vmem:[%s4501_s8 + $0xf0] ss:$8 sps:$4 sm:$0xff]  }
 0x50b   :  { %v1357_v1 = vpop.f32.mrb[28].mxu0 }
 0x50c   :  { %v1359_v3 = vpop.f32.mrb[29].mxu0  ;;  %v1389_v6 = vpack.c.bf16 %v1357_v1, %v1357_v1  ;;  %v3419_v1 = vld [vmem:[%s4503_s10 + $0x4] ss:$8 sps:$4 sm:$0xff]  }
 0x50d   :  { %v1390_v4 = vpack.c.bf16 %v1359_v3, %v1359_v3  ;;  %v1361_v5 = vpop.f32.mrb[30].mxu0 }
 0x50e   :  { %v1362_v7 = vpop.f32.mrb[31].mxu0 }
 0x50f   :  { %2964 = vmatprep.mubr.msk.bf16.mxu0 %vm826_vm3, %v1390_v4 }
 0x510   :  { %1547 = vmatmul.mubr.bf16.vlgmr.msra.gmra.mrb[32].mxu0 %v1389_v6 }
 0x511   :  { %1945 = vmatprep.mubr.bf16.mxu0 %v3557_v20  ;;  %1914 = vmatpush1.bf16.msra.mxu0 %v3369_v10 }
 0x512   :  { %1915 = vmatprep.subr.bf16.mxu0 %v3374_v13 }
 0x515   :  { %1916 = vmatpush1.bf16.msra.mxu0 %v3372_v14 }
 0x516   :  { %1917 = vmatprep.subr.bf16.mxu0 %v3380_v9  ;;  %v3422_v9 = vld [vmem:[%s4503_s10 + $0x14] ss:$8 sps:$4 sm:$0xff]  }
 0x519   :  { %1918 = vmatpush1.bf16.msra.mxu0 %v3378_v15 }
 0x51a   :  { %1919 = vmatprep.subr.bf16.mxu0 %v3386_v16 }
 0x51d   :  { %1920 = vmatpush1.bf16.msra.mxu0 %v3384_v17  ;;  %v3420_v17 = vld [vmem:[%s4503_s10 + $0x10] ss:$8 sps:$4 sm:$0xff]  }
 0x51e   :  { %1921 = vmatprep.subr.bf16.mxu0 %v3392_v11  ;;  %v3425_v11 = vld [vmem:[%s4503_s10 + $0x24] ss:$8 sps:$4 sm:$0xff]  }
 0x521   :  { %1922 = vmatpush1.bf16.msra.mxu0 %v3390_v18  ;;  %v3423_v18 = vld [vmem:[%s4503_s10 + $0x20] ss:$8 sps:$4 sm:$0xff]  }
 0x522   :  { %1923 = vmatprep.subr.bf16.mxu0 %v3398_v19  ;;  %v3428_v19 = vld [vmem:[%s4503_s10 + $0x34] ss:$8 sps:$4 sm:$0xff]  }
 0x525   :  { %1924 = vmatpush1.bf16.msra.mxu0 %v3396_v21  ;;  %v3426_v21 = vld [vmem:[%s4503_s10 + $0x30] ss:$8 sps:$4 sm:$0xff]  }
 0x526   :  { %1925 = vmatprep.subr.bf16.mxu0 %v3404_v22  ;;  %v3431_v22 = vld [vmem:[%s4503_s10 + $0x44] ss:$8 sps:$4 sm:$0xff]  }
 0x529   :  { %1926 = vmatpush1.bf16.msra.mxu0 %v3402_v23  ;;  %v3429_v23 = vld [vmem:[%s4503_s10 + $0x40] ss:$8 sps:$4 sm:$0xff]  }
 0x52a   :  { %1927 = vmatprep.subr.bf16.mxu0 %v3410_v24  ;;  %v3434_v24 = vld [vmem:[%s4503_s10 + $0x54] ss:$8 sps:$4 sm:$0xff]  }
 0x52d   :  { %1928 = vmatpush1.bf16.msra.mxu0 %v3408_v25  ;;  %v3432_v25 = vld [vmem:[%s4503_s10 + $0x50] ss:$8 sps:$4 sm:$0xff]  }
 0x52e   :  { %2311 = vmatprep.subr.bf16.mxu0 %v3557_v20 }
 0x5e3   :  { %v1548_v28 = vpop.f32.mrb[32].mxu0 }
 0x5e4   :  { %v1555_v30 = vadd.f32 %v1548_v28, %v1312_v63  ;;  %v1550_v31 = vpop.f32.mrb[33].mxu0  ;;  %v3405_v63 = vld [vmem:[%s4501_s8 + $0xd0] ss:$8 sps:$4 sm:$0xff]   ;;  %v3440_v28 = vld [vmem:[%s4503_s10 + $0x74] ss:$8 sps:$4 sm:$0xff]  }
 0x5e5   :  { %v1556_v32 = vadd.f32 %v1550_v31, %v1314_v0  ;;  %v1552_v33 = vpop.f32.mrb[34].mxu0  ;;  %v3413_v0 = vld [vmem:[%s4501_s8 + $0xe4] ss:$8 sps:$4 sm:$0xff]   ;;  %v3441_v31 = vld [vmem:[%s4503_s10 + $0x80] ss:$8 sps:$4 sm:$0xff]  }
 0x5e6   :  { %v1569_v34 = vadd.f32 %v1562_v27, %v1555_v30  ;;  %v1553_v36 = vpop.f32.mrb[35].mxu0  ;;  %v3435_v27 = vld [vmem:[%s4503_s10 + $0x60] ss:$8 sps:$4 sm:$0xff]   ;;  %v3443_v30 = vld [vmem:[%s4503_s10 + $0x84] ss:$8 sps:$4 sm:$0xff]  }
 0x5e7   :  { %v1570_v37 = vadd.f32 %v1566_v29, %v1556_v32  ;;  %v3438_v29 = vld [vmem:[%s4503_s10 + $0x70] ss:$8 sps:$4 sm:$0xff]   ;;  %v3446_v32 = vld [vmem:[%s4503_s10 + $0x94] ss:$8 sps:$4 sm:$0xff]   ;;  %v3447_v36 = vld [vmem:[%s4503_s10 + $0xa0] ss:$8 sps:$4 sm:$0xff]  }
 0x5e8   :  { %v1571_v38 = vmax.f32 %v1569_v34, 0.0  ;;  %v3444_v33 = vld [vmem:[%s4503_s10 + $0x90] ss:$8 sps:$4 sm:$0xff]   ;;  %v3449_v34 = vld [vmem:[%s4503_s10 + $0xa4] ss:$8 sps:$4 sm:$0xff]  }
 0x5e9   :  { %v1572_v39 = vmax.f32 %v1570_v37, 0.0  ;;  %v3450_v37 = vld [vmem:[%s4503_s10 + $0xb0] ss:$8 sps:$4 sm:$0xff]  }
 0x5ea   :  { %v1575_v40 = vrot.slane %v1571_v38, 4 }
 0x5eb   :  { %v1576_v41 = vrot.slane %v1572_v39, 4 }
 0x5ec   :  { %v1579_v42 = vmax.f32 %v1571_v38, %v1575_v40  ;;  %v3452_v38 = vld [vmem:[%s4503_s10 + $0xb4] ss:$8 sps:$4 sm:$0xff]   ;;  %v3453_v40 = vld [vmem:[%s4503_s10 + $0xc0] ss:$8 sps:$4 sm:$0xff]  }
 0x5ed   :  { %v1580_v43 = vmax.f32 %v1572_v39, %v1576_v41  ;;  %v3455_v39 = vld [vmem:[%s4503_s10 + $0xc4] ss:$8 sps:$4 sm:$0xff]   ;;  %v3458_v41 = vld [vmem:[%s4503_s10 + $0xd4] ss:$8 sps:$4 sm:$0xff]  }
 0x5ef   :  { %v1581_v45 = vmax.f32 %v1579_v42, %v1580_v43  ;;  %v3456_v42 = vld [vmem:[%s4503_s10 + $0xd0] ss:$8 sps:$4 sm:$0xff]   ;;  %v3461_v43 = vld [vmem:[%s4503_s10 + $0xe4] ss:$8 sps:$4 sm:$0xff]  }
 0x5f1   :  { %v1583_v46 = vpack.c.bf16 %v1581_v45, %v1581_v45  ;;  %v3459_v45 = vld [vmem:[%s4503_s10 + $0xe0] ss:$8 sps:$4 sm:$0xff]   ;;  %s3563_s10 = smov [#allocation5]  }
 0x5f3   :  { %v1590_v47 = vsel %vm1588_vm6, %v1583_v46, 0  ;;  %v3462_v46 = vld [vmem:[%s4505_s12] sm:$0xff]  }
 0x5f4   :  { %3173 = vmatpush3.bf16.msra.mxu1 %v1590_v47 }
 0x5f5   :  { %3178 = vmatprep.subr.bf16.mxu1 %v3559_v8 }
 0x5f7   :  { %3175 = vmatmul.mubr.msk.bf16.vlgmr.msra.gmra.mrb[28].mxu1 %vm1584_vm7, %v1582_v48  ;;  %v3464_v48 = vld [vmem:[%s4505_s12 + $0x10] sm:$0xff]  }
 0x5f8   :  { %3179 = vmatpush3.bf16.msra.mxu1 %v1590_v47  ;;  %3180 = vmatprep.mubr.msk.bf16.mxu1 %vm3560_vm5, %v3559_v8  ;;  %v3463_v47 = vld [vmem:[%s4505_s12 + $0x8] sm:$0xff]  }
 0x5f9   :  { %1792 = vmatprep.subr.bf16.mxu1 %v3377_v49  ;;  %v3465_v49 = vld [vmem:[%s4505_s12 + $0x18] sm:$0xff]  }
 0x5ff   :  { %3181 = vmatmul.mubr.msk.bf16.vlgmr.msra.gmra.mrb[32].mxu1 %vm1584_vm7, %v2966_v50  ;;  %v3466_v50 = vld [vmem:[%s4505_s12 + $0x20] sm:$0xff]  }
 0x600   :  { %1793 = vmatpush1.bf16.msra.mxu1 %v3375_v51  ;;  %1824 = vmatprep.mubr.bf16.mxu1 %v3557_v20  ;;  %v3467_v51 = vld [vmem:[%s4505_s12 + $0x28] sm:$0xff]  }
 0x601   :  { %1794 = vmatprep.subr.bf16.mxu1 %v3383_v52  ;;  %v3468_v52 = vld [vmem:[%s4505_s12 + $0x30] sm:$0xff]  }
 0x604   :  { %1795 = vmatpush1.bf16.msra.mxu1 %v3381_v53  ;;  %v3469_v53 = vld [vmem:[%s4505_s12 + $0x38] sm:$0xff]  }
 0x605   :  { %1796 = vmatprep.subr.bf16.mxu1 %v3389_v54  ;;  %v3470_v54 = vld [vmem:[%s4505_s12 + $0x40] sm:$0xff]  }
 0x608   :  { %1797 = vmatpush1.bf16.msra.mxu1 %v3387_v55 }
 0x609   :  { %1798 = vmatprep.subr.bf16.mxu1 %v3395_v56 }
 0x60c   :  { %1799 = vmatpush1.bf16.msra.mxu1 %v3393_v57 }
 0x60d   :  { %1800 = vmatprep.subr.bf16.mxu1 %v3401_v59 }
 0x610   :  { %1801 = vmatpush1.bf16.msra.mxu1 %v3399_v60  ;;  %v1954_v60 = vld [vmem:[%s4502_s9] sm:$0x3] }
 0x611   :  { %1802 = vmatprep.subr.bf16.mxu1 %v3407_v62  ;;  %v1959_v62 = vrot.slane %v1954_v60, %v3890_v35 }
 0x614   :  { %1803 = vmatpush1.bf16.msra.mxu1 %v3405_v63 }
 0x615   :  { %1804 = vmatprep.subr.bf16.mxu1 %v3413_v0 }
 0x618   :  { %1805 = vmatpush1.bf16.msra.mxu1 %v3411_v58  ;;  %v1963_v58 = vrot.slane %v1954_v60, %v3896_v44 }
 0x619   :  { %1806 = vmatprep.subr.bf16.mxu1 %v3416_v61 }
 0x61c   :  { %1807 = vmatpush1.bf16.msra.mxu1 %v3414_v2 }
 0x61d   :  { %2168 = vmatprep.subr.bf16.mxu1 %v3419_v1 }
 0x6ca   :  { %v1626_v3 = vpop.f32.mrb[28].mxu1 }
 0x6cb   :  { %v1648_v4 = vpack.c.bf16 %v1626_v3, %v1626_v3  ;;  %v3176_v5 = vpop.f32.mrb[29].mxu1 }
 0x6cc   :  { %v1629_v6 = vpop.f32.mrb[30].mxu1 }
 0x6cd   :  { %v3177_v7 = vpop.f32.mrb[31].mxu1  ;;  %1946 = vmatmul.mubr.bf16.vlgmr.msra.gmra.mrb[36].mxu0 %v1648_v4 }
 0x6ce   :  { %2312 = vmatpush1.bf16.msra.mxu0 %v3462_v46 }
 0x6cf   :  { %2313 = vmatprep.subr.bf16.mxu0 %v3557_v20 }
 0x6d2   :  { %v1688_v10 = vpop.f32.mrb[32].mxu1  ;;  %2314 = vmatpush1.bf16.msra.mxu0 %v3463_v47 }
 0x6d3   :  { %v1711_v13 = vpack.c.bf16 %v1688_v10, %v1688_v10  ;;  %v3182_v14 = vpop.f32.mrb[33].mxu1  ;;  %2315 = vmatprep.subr.bf16.mxu0 %v3557_v20 }
 0x6d4   :  { %v1691_v15 = vpop.f32.mrb[34].mxu1  ;;  %v3472_v14 = vld [vmem:[%s4505_s12 + $0x50] ss:$0 sps:$4 sm:$0xff]  }
 0x6d5   :  { %1825 = vmatmul.mubr.bf16.vlgmr.msra.gmra.mrb[36].mxu1 %v1711_v13  ;;  %v3183_v16 = vpop.f32.mrb[35].mxu1  ;;  %v3471_v13 = vld [vmem:[%s4505_s12 + $0x48] sm:$0xff]   ;;  %v2002_v15 = vld [vmem:[%s4504_s11] sm:$0x3]  ;;  %s3562_s12 = smov [#allocation3]  }
 0x6d6   :  { %2169 = vmatpush1.bf16.msra.mxu1 %v3417_v12  ;;  %2316 = vmatpush1.bf16.msra.mxu0 %v3464_v48  ;;  %v2007_v16 = vrot.slane %v2002_v15, %v3890_v35 }
 0x6d7   :  { %2170 = vmatprep.subr.bf16.mxu1 %v3422_v9  ;;  %2317 = vmatprep.subr.bf16.mxu0 %v3557_v20  ;;  %v2309_v9 = vsel %vm792_vm2, %v3472_v14, 0  ;;  %v3490_v14 = vld [vmem:[%s4509_s16 + $0x60] ss:$0 sps:$4 sm:$0xff]  }
 0x6da   :  { %2171 = vmatpush1.bf16.msra.mxu1 %v3420_v17  ;;  %2318 = vmatpush1.bf16.msra.mxu0 %v3465_v49  ;;  %v2011_v17 = vrot.slane %v2002_v15, %v3896_v44  ;;  %v3473_v49 = vld [vmem:[%s4507_s14] ss:$8 sps:$4 sm:$0xff]  }
 0x6db   :  { %2172 = vmatprep.subr.bf16.mxu1 %v3425_v11  ;;  %2319 = vmatprep.subr.bf16.mxu0 %v3557_v20  ;;  %v3491_v15 = vld [vmem:[%s4511_s18] sm:$0xff]  }
 0x6de   :  { %2173 = vmatpush1.bf16.msra.mxu1 %v3423_v18  ;;  %2320 = vmatpush1.bf16.msra.mxu0 %v3466_v50  ;;  %v3475_v50 = vld [vmem:[%s4507_s14 + $0x4] ss:$8 sps:$4 sm:$0xff]  }
 0x6df   :  { %2174 = vmatprep.subr.bf16.mxu1 %v3428_v19  ;;  %2321 = vmatprep.subr.bf16.mxu0 %v3557_v20 }
 0x6e2   :  { %2175 = vmatpush1.bf16.msra.mxu1 %v3426_v21  ;;  %2322 = vmatpush1.bf16.msra.mxu0 %v3467_v51  ;;  %v2389_v51 = vld [vmem:[%s4507_s14 + $0x10] sm:$0x33] }
 0x6e3   :  { %2176 = vmatprep.subr.bf16.mxu1 %v3431_v22  ;;  %2323 = vmatprep.subr.bf16.mxu0 %v3557_v20 }
 0x6e6   :  { %2177 = vmatpush1.bf16.msra.mxu1 %v3429_v23  ;;  %2324 = vmatpush1.bf16.msra.mxu0 %v3468_v52  ;;  %v3063_v52 = vcombine.high %v2389_v51, %v2389_v51 }
 0x6e7   :  { %2178 = vmatprep.subr.bf16.mxu1 %v3434_v24  ;;  %2325 = vmatprep.subr.bf16.mxu0 %v3557_v20 }
 0x6ea   :  { %2179 = vmatpush1.bf16.msra.mxu1 %v3432_v25  ;;  %2326 = vmatpush1.bf16.msra.mxu0 %v3469_v53  ;;  %v3062_v53 = vcombine.low %v2389_v51, %v2389_v51 }
 0x6eb   :  { %2180 = vmatprep.subr.bf16.mxu1 %v3437_v26  ;;  %2327 = vmatprep.subr.bf16.mxu0 %v3557_v20 }
 0x6ee   :  { %2181 = vmatpush1.bf16.msra.mxu1 %v3435_v27  ;;  %2328 = vmatpush1.bf16.msra.mxu0 %v3470_v54  ;;  %v2423_v54 = vsel %vm1588_vm6, %v3062_v53, 0 }
 0x6ef   :  { %2182 = vmatprep.subr.bf16.mxu1 %v3440_v28  ;;  %2329 = vmatprep.subr.bf16.mxu0 %v3557_v20  ;;  %v3047_v28 = vld [vmem:[%s4506_s13] ss:$0 sm:$0xff]  ;;  %s3561_s13 = smov 118  }
 0x6f2   :  { %2183 = vmatpush1.bf16.msra.mxu1 %v3438_v29  ;;  %2330 = vmatpush1.bf16.msra.mxu0 %v3471_v13  ;;  %v3489_v13 = vld [vmem:[%s4509_s16 + $0x58] sm:$0xff]  }
 0x6f3   :  { %2184 = vmatprep.subr.bf16.mxu1 %v3443_v30  ;;  %2331 = vmatprep.subr.bf16.mxu0 %v3557_v20 }
 0x6f6   :  { %2185 = vmatpush1.bf16.msra.mxu1 %v3441_v31  ;;  %2332 = vmatpush1.bf16.msra.mxu0 %v2309_v9  ;;  %v2585_v9 = vsel %vm792_vm2, %v3490_v14, 0 }
 0x6f7   :  { %2186 = vmatprep.subr.bf16.mxu1 %v3446_v32  ;;  %3184 = vmatprep.subr.bf16.mxu0 %v3559_v8 }
 0x6fa   :  { %2187 = vmatpush1.bf16.msra.mxu1 %v3444_v33 }
 0x6fb   :  { %2188 = vmatprep.subr.bf16.mxu1 %v3449_v34 }
 0x6fe   :  { %2189 = vmatpush1.bf16.msra.mxu1 %v3447_v36 }
 0x6ff   :  { %2190 = vmatprep.subr.bf16.mxu1 %v3452_v38 }
 0x702   :  { %2191 = vmatpush1.bf16.msra.mxu1 %v3450_v37 }
 0x703   :  { %2192 = vmatprep.subr.bf16.mxu1 %v3455_v39 }
 0x706   :  { %2193 = vmatpush1.bf16.msra.mxu1 %v3453_v40 }
 0x707   :  { %2194 = vmatprep.subr.bf16.mxu1 %v3458_v41 }
 0x70a   :  { %2195 = vmatpush1.bf16.msra.mxu1 %v3456_v42 }
 0x70b   :  { %2196 = vmatprep.subr.bf16.mxu1 %v3461_v43 }
 0x70e   :  { %2197 = vmatpush1.bf16.msra.mxu1 %v3459_v45 }
 0x70f   :  { %2428 = vmatprep.subr.bf16.mxu1 %v3475_v50 }
 0x7a0   :  { %v1947_v55 = vpop.f32.mrb[36].mxu0 }
 0x7a1   :  { %v1949_v56 = vpop.f32.mrb[37].mxu0 }
 0x7a2   :  { %v1951_v57 = vpop.f32.mrb[38].mxu0 }
 0x7a3   :  { %v1952_v59 = vpop.f32.mrb[39].mxu0 }
 0x7a8   :  { %v1826_v63 = vpop.f32.mrb[36].mxu1 }
 0x7a9   :  { %v1948_v0 = vadd.f32 %v1947_v55, %v1826_v63  ;;  %v1828_v61 = vpop.f32.mrb[37].mxu1 }
 0x7aa   :  { %v1950_v2 = vadd.f32 %v1949_v56, %v1828_v61  ;;  %v1830_v1 = vpop.f32.mrb[38].mxu1  ;;  %v3479_v61 = vld [vmem:[%s4509_s16 + $0x8] sm:$0xff]  }
 0x7ab   :  { %v1966_v3 = vadd.f32 %v1959_v62, %v1948_v0  ;;  %v1831_v4 = vpop.f32.mrb[39].mxu1  ;;  %v3481_v1 = vld [vmem:[%s4509_s16 + $0x18] sm:$0xff]  }
 0x7ac   :  { %v1967_v5 = vadd.f32 %v1963_v58, %v1950_v2  ;;  %v3478_v58 = vld [vmem:[%s4509_s16] sm:$0xff]   ;;  %v3480_v2 = vld [vmem:[%s4509_s16 + $0x10] sm:$0xff]   ;;  %v3483_v4 = vld [vmem:[%s4509_s16 + $0x28] sm:$0xff]  }
 0x7ad   :  { %v1968_v6 = vmax.f32 %v1966_v3, 0.0  ;;  %v3482_v3 = vld [vmem:[%s4509_s16 + $0x20] sm:$0xff]  }
 0x7ae   :  { %v1969_v7 = vmax.f32 %v1967_v5, 0.0  ;;  %v3484_v5 = vld [vmem:[%s4509_s16 + $0x30] sm:$0xff]  }
 0x7af   :  { %v2000_v12 = vpack.c.bf16 %v1968_v6, %v1968_v6  ;;  %v3485_v6 = vld [vmem:[%s4509_s16 + $0x38] sm:$0xff]  }
 0x7b0   :  { %v2001_v10 = vpack.c.bf16 %v1969_v7, %v1969_v7  ;;  %v3486_v7 = vld [vmem:[%s4509_s16 + $0x40] sm:$0xff]  }
 0x7b2   :  { %3046 = vmatprep.mubr.msk.bf16.mxu1 %vm2164_vm8, %v2001_v10  ;;  %v3487_v10 = vld [vmem:[%s4509_s16 + $0x48] sm:$0xff]  }
 0x7b3   :  { %2201 = vmatmul.mubr.bf16.vlgmr.msra.gmra.mrb[40].mxu1 %v2000_v12  ;;  %v3488_v12 = vld [vmem:[%s4509_s16 + $0x50] sm:$0xff]  }
 0x7b4   :  { %2460 = vmatprep.mubr.bf16.mxu1 %v3557_v20  ;;  %2429 = vmatpush1.bf16.msra.mxu1 %v3473_v49 }
 0x7b5   :  { %3064 = vmatprep.subr.msk.bf16.mxu1 %vm1588_vm6, %v3063_v52 }
 0x7b8   :  { %2431 = vmatpush1.bf16.msra.mxu1 %v2423_v54 }
 0x7b9   :  { %2587 = vmatprep.subr.bf16.mxu1 %v3557_v20 }
 0x886   :  { %v2202_v11 = vpop.f32.mrb[40].mxu1 }
 0x887   :  { %v2203_v18 = vadd.f32 %v2202_v11, %v2007_v16  ;;  %v2204_v19 = vpop.f32.mrb[41].mxu1  ;;  %v3492_v16 = vld [vmem:[%s4511_s18 + $0x8] sm:$0xff]  }
 0x888   :  { %v2205_v21 = vadd.f32 %v2204_v19, %v2011_v17  ;;  %v2206_v22 = vpop.f32.mrb[42].mxu1  ;;  %v3494_v17 = vld [vmem:[%s4511_s18 + $0x18] sm:$0xff]  }
 0x889   :  { %v2209_v23 = vmax.f32 %v2203_v18, 0.0  ;;  %v2207_v24 = vpop.f32.mrb[43].mxu1  ;;  %v2391_v18 = vld [vmem:[%s4508_s15] sm:$0x3] }
 0x88a   :  { %v2210_v25 = vmax.f32 %v2205_v21, 0.0  ;;  %v2396_v19 = vrot.slane %v2391_v18, %v3890_v35  ;;  %v2400_v21 = vrot.slane %v2391_v18, %v3896_v44  ;;  %v3496_v35 = vld [vmem:[%s4511_s18 + $0x28] ss:$0 sps:$4 sm:$0x33]  }
 0x88b   :  { %v2232_v27 = vpack.c.bf16 %v2209_v23, %v2209_v23  ;;  %v2685_v44 = vsel %vm1588_vm6, %v3496_v35, 0 }
 0x88c   :  { %v2233_v26 = vpack.c.bf16 %v2210_v25, %v2210_v25 }
 0x88e   :  { %3059 = vmatprep.mubr.msk.bf16.mxu0 %vm2304_vm9, %v2233_v26 }
 0x88f   :  { %2344 = vmatmul.mubr.bf16.vlgmr.msra.gmra.mrb[40].mxu0 %v2232_v27 }
 0x890   :  { %3196 = vmatprep.mubr.msk.bf16.mxu0 %vm3560_vm5, %v3559_v8  ;;  %3185 = vmatpush3.bf16.msra.mxu0 %v3491_v15 }
 0x891   :  { %3186 = vmatprep.subr.bf16.mxu0 %v3559_v8 }
 0x894   :  { %3187 = vmatpush3.bf16.msra.mxu0 %v3492_v16 }
 0x895   :  { %3188 = vmatprep.subr.bf16.mxu0 %v3559_v8 }
 0x962   :  { %v2345_v29 = vpop.f32.mrb[40].mxu0 }
 0x963   :  { %v2346_v30 = vadd.f32 %v3047_v28, %v2345_v29  ;;  %v2347_v31 = vpop.f32.mrb[41].mxu0 }
 0x964   :  { %v2348_v32 = vpop.f32.mrb[42].mxu0 }
 0x965   :  { %v2349_v33 = vpop.f32.mrb[43].mxu0  ;;  %v2364_v34 = vsel %vm2363_vm10, %v2346_v30, -inf  ;;  %v2352_v36 = vsel %vm2351_vm11, %v2346_v30, -inf  ;;  %v3495_v32 = vld [vmem:[%s4511_s18 + $0x20] sm:$0xff]  }
 0x966   :  { %2365 = vmax.xlane.f32.xlu1 %v2364_v34  ;;  %v3066_v33 = vld [vmem:[%s4510_s17] ss:$0 sm:$0xff] }
 0x96a   :  { %2353 = vmax.xlane.f32.xlu1 %v2352_v36 }
 0x9f3   :  { %v2366_v37 = vpop.xlane.xlu1 %2365 }
 0x9f4   :  { %v2367_v38 = vsub.f32 %v2346_v30, %v2366_v37 }
 0x9f6   :  { %v2368_v39 = vmul.f32 1.442695, %v2367_v38 }
 0x9f7   :  { %v2354_v40 = vpop.xlane.xlu1 %2353 }
 0x9f8   :  { %3497 = vpow2.f32 %v2368_v39  ;;  %v2355_v41 = vsub.f32 %v2346_v30, %v2354_v40 }
 0x9fa   :  { %v2356_v42 = vmul.f32 1.442695, %v2355_v41 }
 0x9fc   :  { %3499 = vpow2.f32 %v2356_v42 }
 0xa02   :  { %v3498_v43 = vpop.eup %3497 }
 0xa03   :  { %2371 = vrot.lane.b32.xlu0 %v3498_v43, %s3561_s13 }
 0xa06   :  { %v3500_v45 = vpop.eup %3499 }
 0xa07   :  { %v2358_v46 = vsel %vm2351_vm11, %v3500_v45, 0.0 }
 0xa08   :  { %2359 = vadd.xlane.f32.xlu1 %v2358_v46 }
 0xa75   :  { %v2372_v47 = vpop.permute.xlu0 %2371 }
 0xa76   :  { %v2374_v48 = vsel %vm2351_vm11, %v2372_v47, 0.0 }
 0xa77   :  { %2375 = vadd.xlane.f32.xlu0 %v2374_v48 }
 0xa95   :  { %v2360_v55 = vpop.xlane.xlu1 %2359 }
 0xa96   :  { %3501 = vrcp.f32 %v2360_v55 }
 0xaa0   :  { %v3502_v56 = vpop.eup %3501 }
 0xaa1   :  { %v2362_v57 = vmul.f32 %v3502_v56, %v3500_v45 }
 0xaa3   :  { %2379 = vst.msk [vmem:[#allocation3] sm:$0x3] %vm2351_vm11, %v2362_v57 }
 0xb04   :  { %v2376_v59 = vpop.xlane.xlu0 %2375 }
 0xb05   :  { %3503 = vrcp.f32 %v2376_v59 }
 0xb0f   :  { %v3504_v60 = vpop.eup %3503 }
 0xb10   :  { %v2378_v62 = vmul.f32 %v3504_v60, %v3498_v43 }
 0xb12   :  { %2381 = vrot.lane.b32.xlu1 %v2378_v62, %s3561_s13  ;;  %v2386_v63 = vsel %vm2385_vm12, %v2362_v57, %v2378_v62  ;;  %s2741_s13 = sshll.u32 %s3562_s12, 4  ;;  %s2742_s13 = int_to_ptr.vmem [resolvable:$true] %s2741_s13 }
 0xb13   :  { %v2390_v0 = vpack.c.bf16 %v2386_v63, %v2386_v63  ;;  %s3509_s29 = scalar_lea.vmem %s2742_s13, 32  ;;  %p3514_p1 = scmp.lt.s32.totalorder %s2742_s13, %s2742_s13 }
 0xb14   :  { %p3510_p0 = scmp.ne.s32.totalorder %s2742_s13, %s3509_s29  ;;  %p3515_p2 = scmp.lt.s32.totalorder %s3509_s29, %s3509_s29 }
 0xb15   :  { %3065 = vmatmul.mubr.msk.bf16.vlgmr.msra.gmra.mrb[44].mxu1 %vm2418_vm13, %v2390_v0 }
 0xb16   :  { %2588 = vmatpush1.bf16.msra.mxu1 %v3478_v58  ;;  %p3516_p3 = por %p3515_p2, %p3514_p1 }
 0xb17   :  { %2589 = vmatprep.subr.bf16.mxu1 %v3557_v20 }
 0xb18   :  { %p3517_p4 = pnand %p3516_p3, %p3510_p0 }
 0xb1a   :  { %2590 = vmatpush1.bf16.msra.mxu1 %v3479_v61 }
 0xb1b   :  { %2591 = vmatprep.subr.bf16.mxu1 %v3557_v20 }
 0xb1e   :  { %2592 = vmatpush1.bf16.msra.mxu1 %v3480_v2 }
 0xb1f   :  { %2593 = vmatprep.subr.bf16.mxu1 %v3557_v20 }
 0xb22   :  { %2594 = vmatpush1.bf16.msra.mxu1 %v3481_v1 }
 0xb23   :  { %2595 = vmatprep.subr.bf16.mxu1 %v3557_v20 }
 0xb26   :  { %2596 = vmatpush1.bf16.msra.mxu1 %v3482_v3 }
 0xb27   :  { %2597 = vmatprep.subr.bf16.mxu1 %v3557_v20 }
 0xb2a   :  { %2598 = vmatpush1.bf16.msra.mxu1 %v3483_v4 }
 0xb2b   :  { %2599 = vmatprep.subr.bf16.mxu1 %v3557_v20 }
 0xb2e   :  { %2600 = vmatpush1.bf16.msra.mxu1 %v3484_v5 }
 0xb2f   :  { %2601 = vmatprep.subr.bf16.mxu1 %v3557_v20 }
 0xb32   :  { %2602 = vmatpush1.bf16.msra.mxu1 %v3485_v6 }
 0xb33   :  { %2603 = vmatprep.subr.bf16.mxu1 %v3557_v20 }
 0xb36   :  { %2604 = vmatpush1.bf16.msra.mxu1 %v3486_v7 }
 0xb37   :  { %2605 = vmatprep.subr.bf16.mxu1 %v3557_v20 }
 0xb3a   :  { %2606 = vmatpush1.bf16.msra.mxu1 %v3487_v10 }
 0xb3b   :  { %2607 = vmatprep.subr.bf16.mxu1 %v3557_v20 }
 0xb3e   :  { %2608 = vmatpush1.bf16.msra.mxu1 %v3488_v12 }
 0xb3f   :  { %2609 = vmatprep.subr.bf16.mxu1 %v3557_v20 }
 0xb42   :  { %2610 = vmatpush1.bf16.msra.mxu1 %v3489_v13 }
 0xb43   :  { %2611 = vmatprep.subr.bf16.mxu1 %v3557_v20  ;;  %v3493_v20 = vld [vmem:[%s4511_s18 + $0x10] sm:$0xff]   ;;  %s2751_s18 = sshll.u32 %s3563_s10, 4  ;;  %s2752_s18 = int_to_ptr.vmem [resolvable:$true] %s2751_s18 }
 0xb44   :  { %3189 = vmatpush3.bf16.msra.mxu0 %v3493_v20 }
 0xb45   :  { %3190 = vmatprep.subr.bf16.mxu0 %v3559_v8 }
 0xb46   :  { %2612 = vmatpush1.bf16.msra.mxu1 %v2585_v9 }
 0xb48   :  { %3191 = vmatpush3.bf16.msra.mxu0 %v3494_v17 }
 0xb49   :  { %3192 = vmatprep.subr.bf16.mxu0 %v3559_v8 }
 0xb4c   :  { %3193 = vmatpush3.bf16.msra.mxu0 %v3495_v32 }
 0xb4d   :  { %3194 = vmatprep.subr.bf16.mxu0 %v3559_v8 }
 0xb50   :  { %3195 = vmatpush3.bf16.msra.mxu0 %v2685_v44 }
 0xb84   :  { %v2382_v11 = vpop.permute.xlu1 %2381 }
 0xb85   :  { %2384 = vst.msk [vmem:[#allocation5] sm:$0x3] %vm2351_vm11, %v2382_v11 }
 0xbe8   :  { %v2462_v22 = vpop.f32.mrb[44].mxu1 }
 0xbe9   :  { %v2463_v23 = vadd.f32 %v2462_v22, %v2396_v19  ;;  %v2464_v24 = vpop.f32.mrb[45].mxu1 }
 0xbea   :  { %v2465_v25 = vadd.f32 %v2464_v24, %v2400_v21  ;;  %v2466_v26 = vpop.f32.mrb[46].mxu1 }
 0xbeb   :  { %v2469_v27 = vmax.f32 %v2463_v23, 0.0  ;;  %v2467_v28 = vpop.f32.mrb[47].mxu1 }
 0xbec   :  { %v2470_v29 = vmax.f32 %v2465_v25, 0.0 }
 0xbed   :  { %v2496_v31 = vpack.c.bf16 %v2469_v27, %v2469_v27 }
 0xbee   :  { %v2497_v30 = vpack.c.bf16 %v2470_v29, %v2470_v29 }
 0xbf0   :  { %3080 = vmatprep.mubr.msk.bf16.mxu1 %vm2580_vm14, %v2497_v30 }
 0xbf1   :  { %2620 = vmatmul.mubr.bf16.vlgmr.msra.gmra.mrb[48].mxu1 %v2496_v31 }
 0xcc4   :  { %v2621_v34 = vpop.f32.mrb[48].mxu1 }
 0xcc5   :  { %v2622_v36 = vadd.f32 %v3066_v33, %v2621_v34  ;;  %v2623_v37 = vpop.f32.mrb[49].mxu1 }
 0xcc6   :  { %v2624_v38 = vpop.f32.mrb[50].mxu1 }
 0xcc7   :  { %v2627_v39 = vmax.f32 %v2622_v36, 0.0  ;;  %v2625_v40 = vpop.f32.mrb[51].mxu1 }
 0xcc9   :  { %v2639_v41 = vpack.c.bf16 %v2627_v39, %v2627_v39 }
 0xccb   :  { %3197 = vmatmul.mubr.msk.bf16.vlgmr.msra.gmra.mrb[44].mxu0 %vm2680_vm15, %v2639_v41 }
 0xccc   :  { %3520 = shalt.err (!%p3517_p4)
}
 0xccd   :  { %s3521_s24 = scalar_lea.hbm %s4513_s20, 32 }
 0xcce   :  { %p3522_p5 = scmp.ne.s32.totalorder %s4513_s20, %s3521_s24  ;;  %p3525_p6 = scmp.lt.u32.totalorder %s3521_s24, %s4513_s20 }
 0xcd0   :  { %p3527_p7 = pnand %p3525_p6, %p3522_p5 }
 0xcd2   :  { %3530 = shalt.err (!%p3527_p7)
}
 0xcd3   :  { %2744 = dma.vmem_to_hbm [thread:$0]  %s2742_s13, 32, %s4513_s20, [#allocation4]  }
 0xcd4   :  { %s3531_s23 = scalar_lea.vmem %s2752_s18, 32  ;;  %p3536_p9 = scmp.lt.s32.totalorder %s2752_s18, %s2752_s18 }
 0xcd5   :  { %p3532_p8 = scmp.ne.s32.totalorder %s2752_s18, %s3531_s23  ;;  %p3537_p10 = scmp.lt.s32.totalorder %s3531_s23, %s3531_s23 }
 0xcd7   :  { %p3538_p11 = por %p3537_p10, %p3536_p9 }
 0xcd9   :  { %p3539_p12 = pnand %p3538_p11, %p3532_p8 }
 0xcdb   :  { %3542 = shalt.err (!%p3539_p12)
}
 0xcdc   :  { %s3543_s28 = scalar_lea.hbm %s4514_s21, 32 }
 0xcdd   :  { %p3544_p13 = scmp.ne.s32.totalorder %s4514_s21, %s3543_s28  ;;  %p3547_p0 = scmp.lt.u32.totalorder %s3543_s28, %s4514_s21 }
 0xcdf   :  { %p3549_p1 = pnand %p3547_p0, %p3544_p13 }
 0xce1   :  { %3552 = shalt.err (!%p3549_p1)
}
 0xce2   :  { %2754 = dma.vmem_to_hbm [thread:$0]  %s2752_s18, 32, %s4514_s21, [#allocation6]   ;;  %v3081_v8 = vld [vmem:[#allocation2] ss:$0 sm:$0xff]  ;;  %vm2733_vm0 = vcmask 1024  }
 0xd9e   :  { %v2721_v42 = vpop.f32.mrb[44].mxu0 }
 0xd9f   :  { %v2722_v43 = vadd.f32 %v3081_v8, %v2721_v42  ;;  %v3198_v45 = vpop.f32.mrb[45].mxu0 }
 0xda0   :  { %v2724_v46 = vpop.f32.mrb[46].mxu0 }
 0xda1   :  { %v2727_v47 = vsub.f32 0.0, %v2722_v43  ;;  %v3199_v48 = vpop.f32.mrb[47].mxu0 }
 0xda3   :  { %v2728_v49 = vmul.f32 1.442695, %v2727_v47 }
 0xda5   :  { %3505 = vpow2.f32 %v2728_v49 }
 0xdaf   :  { %v3506_v50 = vpop.eup %3505 }
 0xdb0   :  { %v2730_v51 = vadd.f32 1.0, %v3506_v50 }
 0xdb2   :  { %3507 = vrcp.f32 %v2730_v51 }
 0xdbc   :  { %v3508_v52 = vpop.eup %3507 }
 0xdbd   :  { %2734 = vst.msk [vmem:[%s4515_s22] sm:$0x3] %vm2733_vm0, %v3508_v52 }
 0xdbe   :  { %3553 = dma.done.wait [#allocation4], 32  }
 0xdbf   :  { %3554 = vsyncadd [#allocation4], 4294967264 }
 0xdc0   :  { %3555 = dma.done.wait [#allocation6], 32  }
 0xdc1   :  { %3556 = vsyncadd [#allocation6], 4294967264 }
 0xdc2   :  { %2765 = vsyncpa [#allocation4], 1 }
 0xdc3   :  { %2766 = vsyncpa [#allocation6], 1 }

</bundles_post_ra>
